<compile_context>
chip_gen: v6e
topology: v6e:2x2x1
jax: 0.10.0
libtpu: 0.0.40
codegen_flags: <defaults>
</compile_context>

<pallas_src>
import jax
import jax.numpy as jnp
from jax.experimental import pallas as pl
from jax.experimental.pallas import tpu as pltpu


def chain_lstm_kernel(len_ref, h0_ref, c0_ref, proj_ref,
                      whh0_ref, wih1_ref, whh1_ref, b1_ref,
                      hout_ref,
                      h0_s, c0_s, h1_s, c1_s):
    Bb, H = h0_ref.shape
    CHUNK = proj_ref.shape[0]
    G = 4 * H
    H3 = 3 * H

    c = pl.program_id(1)

    # Initialize recurrent state from the root-expanded (h0, c0), same for both layers.
    @pl.when(c == 0)
    def _():
        h0_s[...] = h0_ref[...]
        c0_s[...] = c0_ref[...]
        h1_s[...] = h0_ref[...]
        c1_s[...] = c0_ref[...]

    # State is loaded ONCE per chunk and carried in vregs through the unrolled loop.
    h0s = h0_s[...]
    c0s = c0_s[...]
    h1s = h1_s[...]
    c1s = c1_s[...]

    lens = len_ref[...]                                   # (Bb, 1) int32
    whh0 = whh0_ref[...]                                  # (H, 4H) bf16
    wih1 = wih1_ref[...]                                  # (H, 4H) bf16
    whh1 = whh1_ref[...]                                  # (H, 4H) bf16
    b1 = jnp.broadcast_to(b1_ref[...], (Bb, G))           # hoisted broadcast (loop-invariant)

    t0 = c * CHUNK

    def gates(pre):
        # Gate columns were permuted to [i, f, o, g] at weight-prep time, so sigmoid only
        # touches the first 3H columns and tanh only the last H (no redundant EUP work).
        sig = jax.nn.sigmoid(pre[:, :H3])
        g = jnp.tanh(pre[:, H3:])
        return sig[:, 0 * H:1 * H], sig[:, 1 * H:2 * H], sig[:, 2 * H:H3], g  # i, f, o, g

    # Statically-unrolled (bounded, CHUNK <= 32) time loop: per-step grid/pipeline overhead is
    # amortized and state touches VMEM only at chunk boundaries.
    for t in range(CHUNK):
        valid = (t0 + t) < lens                           # (Bb, 1) packed-sequence mask

        # layer 0: input projection precomputed (bf16 stream); only h @ W_hh0 is serial.
        pre0 = proj_ref[t].astype(jnp.float32) + jnp.dot(
            h0s.astype(jnp.bfloat16), whh0, preferred_element_type=jnp.float32)
        i0, f0, o0, g0 = gates(pre0)
        c0n = f0 * c0s + i0 * g0
        h0n = o0 * jnp.tanh(c0n)

        # layer 1: two K=H bf16 dots accumulated in f32 (no per-step concat on the
        # recurrence path; dropout = identity at inference).
        pre1 = (jnp.dot(h0n.astype(jnp.bfloat16), wih1, preferred_element_type=jnp.float32)
                + jnp.dot(h1s.astype(jnp.bfloat16), whh1, preferred_element_type=jnp.float32)
                + b1)
        i1, f1, o1, g1 = gates(pre1)
        c1n = f1 * c1s + i1 * g1
        h1n = o1 * jnp.tanh(c1n)

        # Freeze state for sequences that have already ended (all state stays f32).
        h0s = jnp.where(valid, h0n, h0s)
        c0s = jnp.where(valid, c0n, c0s)
        h1s = jnp.where(valid, h1n, h1s)
        c1s = jnp.where(valid, c1n, c1s)

    # Write state back once per chunk (carried to the next chunk via persistent scratch).
    h0_s[...] = h0s
    c0_s[...] = c0s
    h1_s[...] = h1s
    c1_s[...] = c1s

    # After the last chunk, h1s holds output[i, len_i - 1, :]; the decoder runs outside.
    @pl.when(c == pl.num_programs(1) - 1)
    def _():
        hout_ref[...] = h1s.astype(hout_ref.dtype)


def _const_spec(shape):
    """BlockSpec for grid-invariant (constant index map) inputs.

    Requests single buffering (they never change block index, so double-buffering only
    doubles their VMEM residency — matters under v7x's 64 MiB). Falls back gracefully if
    the installed JAX does not support pipeline_mode.
    """
    try:
        return pl.BlockSpec(shape, lambda b, c: (0, 0), pipeline_mode=pl.Buffered(1))
    except TypeError:
        return pl.BlockSpec(shape, lambda b, c: (0, 0))


def chain_lstm_forward(x_btd, lengths, h0, c0, p, *, chunk=None, batch_block=None):
    """x_btd: (B, T, D) float32 (batch_first, like PyTorch); lengths: (B,) int32."""
    B, T, D = x_btd.shape
    H = p["whh0"].shape[0]
    G = 4 * H

    # Permute gate columns from PyTorch order [i, f, g, o] to [i, f, o, g] so the kernel can
    # apply sigmoid to one contiguous 3H block and tanh to one H block. Pure weight reshuffle.
    r = jnp.arange(H)
    perm = jnp.concatenate([r, r + H, r + 3 * H, r + 2 * H])
    wih0 = p["wih0"][:, perm]
    whh0 = p["whh0"][:, perm].astype(jnp.bfloat16)
    wih1 = p["wih1"][:, perm].astype(jnp.bfloat16)
    whh1 = p["whh1"][:, perm].astype(jnp.bfloat16)
    b0 = p["b0"][:, perm]
    b1 = p["b1"][:, perm]

    # Layer-0 input projection for every timestep as ONE well-shaped matmul (off the serial
    # recurrence path), emitted time-major and stored bf16 so the kernel streams a lane-dense
    # half-width (B, 4H) slab per step.
    proj = (jnp.einsum("btd,dg->tbg", x_btd, wih0) + b0).astype(jnp.bfloat16)  # (T, B, 4H)

    if chunk is None:
        chunk = T if T <= 32 else 32        # bounded static unroll per grid step
    Tp = -(-T // chunk) * chunk             # pad time to a chunk multiple
    Bp = -(-B // 8) * 8                     # pad batch to a sublane multiple (f32 state)

    proj = jnp.pad(proj, ((0, Tp - T), (0, Bp - B), (0, 0)))
    len2d = jnp.pad(lengths.astype(jnp.int32), (0, Bp - B)).reshape(Bp, 1)
    h0p = jnp.pad(h0, ((0, Bp - B), (0, 0)))
    c0p = jnp.pad(c0, ((0, Bp - B), (0, 0)))

    if batch_block is None:
        # On v7x with large Bp use Bp // 2 (one block per TensorCore) only when each half still
        # has >= ~32-64 rows; for small B a single block avoids useless grid steps.
        batch_block = Bp
    nb = Bp // batch_block
    nc = Tp // chunk

    grid_spec = pltpu.PrefetchScalarGridSpec(
        num_scalar_prefetch=0,
        grid=(nb, nc),
        in_specs=[
            pl.BlockSpec((batch_block, 1), lambda b, c: (b, 0)),            # lengths
            pl.BlockSpec((batch_block, H), lambda b, c: (b, 0)),            # h0
            pl.BlockSpec((batch_block, H), lambda b, c: (b, 0)),            # c0
            pl.BlockSpec((chunk, batch_block, G), lambda b, c: (c, b, 0)),  # x@Wih0 + b0 (bf16)
            _const_spec((H, G)),                                            # whh0  (bf16)
            _const_spec((H, G)),                                            # wih1  (bf16)
            _const_spec((H, G)),                                            # whh1  (bf16)
            _const_spec((1, G)),                                            # b1    (f32)
        ],
        out_specs=pl.BlockSpec((batch_block, H), lambda b, c: (b, 0)),
        scratch_shapes=[pltpu.VMEM((batch_block, H), jnp.float32) for _ in range(4)],
    )

    h1_final = pl.pallas_call(
        chain_lstm_kernel,
        out_shape=jax.ShapeDtypeStruct((Bp, H), jnp.float32),
        grid_spec=grid_spec,
        compiler_params=pltpu.CompilerParams(
            dimension_semantics=("parallel", "arbitrary"),
            vmem_limit_bytes=64 * 1024 * 1024),
    )(len2d, h0p, c0p, proj, whh0, wih1, whh1, b1)

    # Decoder hoisted out of the kernel: used exactly once, off the serial path, and for real
    # vocab sizes (H x V) would otherwise sit in VMEM for the whole time loop.
    return h1_final[:B] @ p["wdec"] + p["bdec"]


def ref_chain_lstm(x, lengths, h0, c0, p):
    """Pure-JAX f32 reference of the same forward semantics (original gate order)."""
    B, T, _ = x.shape
    H = p["whh0"].shape[0]
    h0s, c0s, h1s, c1s = h0, c0, h0, c0

    def cell(x_in, h_prev, c_prev, wih, whh, b):
        pre = x_in @ wih + h_prev @ whh + b
        i = jax.nn.sigmoid(pre[:, :H])
        f = jax.nn.sigmoid(pre[:, H:2 * H])
        g = jnp.tanh(pre[:, 2 * H:3 * H])
        o = jax.nn.sigmoid(pre[:, 3 * H:])
        c = f * c_prev + i * g
        return o * jnp.tanh(c), c

    for t in range(T):
        valid = (t < lengths).reshape(B, 1)
        h0n, c0n = cell(x[:, t], h0s, c0s, p["wih0"], p["whh0"], p["b0"])
        h1n, c1n = cell(h0n, h1s, c1s, p["wih1"], p["whh1"], p["b1"])
        h0s = jnp.where(valid, h0n, h0s)
        c0s = jnp.where(valid, c0n, c0s)
        h1s = jnp.where(valid, h1n, h1s)
        c1s = jnp.where(valid, c1n, c1s)
    return h1s @ p["wdec"] + p["bdec"]


def make_params(key, in_dim, hidden_dim, vocab_size):
    """Deterministic synthetic parameters matching the module's shapes/init."""
    ks = jax.random.split(key, 10)
    bound = 1.0 / jnp.sqrt(hidden_dim)   # PyTorch nn.LSTM default init range
    u = lambda k, shp, b: jax.random.uniform(k, shp, jnp.float32, -b, b)
    params = {
        # stored pre-transposed: (in_features, 4H), PyTorch gate order i, f, g, o
        "wih0": u(ks[0], (in_dim, 4 * hidden_dim), bound),
        "whh0": u(ks[1], (hidden_dim, 4 * hidden_dim), bound),
        "b0":   u(ks[2], (1, 4 * hidden_dim), bound)
              + u(ks[3], (1, 4 * hidden_dim), bound),    # b_ih + b_hh
        "wih1": u(ks[4], (hidden_dim, 4 * hidden_dim), bound),
        "whh1": u(ks[5], (hidden_dim, 4 * hidden_dim), bound),
        "b1":   u(ks[6], (1, 4 * hidden_dim), bound)
              + u(ks[7], (1, 4 * hidden_dim), bound),
        # decoder: weight uniform(-0.1, 0.1), bias zero (init_weights)
        "wdec": u(ks[8], (hidden_dim, vocab_size), 0.1),
        "bdec": jnp.zeros((1, vocab_size), jnp.float32),
    }
    return params


if __name__ == "__main__":
    B, T, D, H, V = 4, 8, 32, 32, 64   # small shapes: in_dim=hidden=32, vocab=64

    key = jax.random.PRNGKey(0)
    k_x, k_root, k_p = jax.random.split(key, 3)

    params = make_params(k_p, D, H, V)

    x = jax.random.normal(k_x, (B, T, D), jnp.float32)          # batch_first input
    lengths = jnp.array([8, 5, 3, 6], jnp.int32)                 # per-sequence lengths
    root = jax.random.normal(k_root, (H,), jnp.float32)          # init_hidden "root"
    h0 = jnp.broadcast_to(root, (B, H)).astype(jnp.float32)      # root.expand(...)
    c0 = jnp.broadcast_to(root, (B, H)).astype(jnp.float32)

    decoded = chain_lstm_forward(x, lengths, h0, c0, params)
    decoded = jax.block_until_ready(decoded)

    expected = ref_chain_lstm(x, lengths, h0, c0, params)
    assert decoded.shape == (B, V)
    # Tolerance relaxed vs. the all-f32 version: MXU operands / proj stream are bf16 and the
    # recurrent error accumulates over T (state and gate nonlinearities remain f32).
    max_err = float(jnp.max(jnp.abs(decoded - expected)))
    assert jnp.allclose(decoded, expected, atol=3e-2, rtol=3e-2), max_err

    print("KERNEL_OK")
</pallas_src>

<mosaic_0001>
module attributes {stable_mosaic.version = 11 : i64} {
  func.func @chain_lstm_kernel(%arg0: i32, %arg1: i32, %arg2: memref<8x1xi32, #tpu.memory_space<vmem>>, %arg3: memref<8x32xf32, #tpu.memory_space<vmem>>, %arg4: memref<8x32xf32, #tpu.memory_space<vmem>>, %arg5: memref<8x8x128xbf16, #tpu.memory_space<vmem>>, %arg6: memref<32x128xbf16, #tpu.memory_space<vmem>>, %arg7: memref<32x128xbf16, #tpu.memory_space<vmem>>, %arg8: memref<32x128xbf16, #tpu.memory_space<vmem>>, %arg9: memref<1x128xf32, #tpu.memory_space<vmem>>, %arg10: memref<8x32xf32, #tpu.memory_space<vmem>>, %arg11: memref<8x32xf32, #tpu.memory_space<vmem>>, %arg12: memref<8x32xf32, #tpu.memory_space<vmem>>, %arg13: memref<8x32xf32, #tpu.memory_space<vmem>>, %arg14: memref<8x32xf32, #tpu.memory_space<vmem>>) attributes {dimension_semantics = [#tpu.dimension_semantics<parallel>, #tpu.dimension_semantics<arbitrary>], iteration_bounds = array<i64: 1, 1>, scalar_prefetch = 0 : i64, scratch_operands = 4 : i64, tpu.core_type = #tpu.core_type<tc>, window_params = [{transform_indices = @transform_0, window_bounds = array<i64: 8, 1>}, {transform_indices = @transform_1, window_bounds = array<i64: 8, 32>}, {transform_indices = @transform_2, window_bounds = array<i64: 8, 32>}, {transform_indices = @transform_3, window_bounds = array<i64: 8, 8, 128>}, {pipeline_mode = #tpu.pipeline_mode<synchronous>, transform_indices = @transform_4, window_bounds = array<i64: 32, 128>}, {pipeline_mode = #tpu.pipeline_mode<synchronous>, transform_indices = @transform_5, window_bounds = array<i64: 32, 128>}, {pipeline_mode = #tpu.pipeline_mode<synchronous>, transform_indices = @transform_6, window_bounds = array<i64: 32, 128>}, {pipeline_mode = #tpu.pipeline_mode<synchronous>, transform_indices = @transform_7, window_bounds = array<i64: 1, 128>}, {transform_indices = @transform_8, window_bounds = array<i64: 8, 32>}]} {
    %c0_i32 = arith.constant 0 : i32
    %0 = arith.cmpi eq, %arg1, %c0_i32 : i32
    %1 = arith.extui %0 : i1 to i32
    %c0_i32_0 = arith.constant 0 : i32
    %2 = arith.cmpi ne, %1, %c0_i32_0 : i32
    scf.if %2 {
      %c0_85 = arith.constant 0 : index
      %c0_86 = arith.constant 0 : index
      %494 = vector.load %arg3[%c0_85, %c0_86] : memref<8x32xf32, #tpu.memory_space<vmem>>, vector<8x32xf32>
      %c0_87 = arith.constant 0 : index
      %c0_88 = arith.constant 0 : index
      %495 = vector.load %arg11[%c0_87, %c0_88] : memref<8x32xf32, #tpu.memory_space<vmem>>, vector<8x32xf32>
      tpu.vector_store %arg11[%c0_87, %c0_88], %494 {strides = array<i32>} : memref<8x32xf32, #tpu.memory_space<vmem>>, vector<8x32xf32>,
      %c0_89 = arith.constant 0 : index
      %c0_90 = arith.constant 0 : index
      %496 = vector.load %arg4[%c0_89, %c0_90] : memref<8x32xf32, #tpu.memory_space<vmem>>, vector<8x32xf32>
      %c0_91 = arith.constant 0 : index
      %c0_92 = arith.constant 0 : index
      %497 = vector.load %arg12[%c0_91, %c0_92] : memref<8x32xf32, #tpu.memory_space<vmem>>, vector<8x32xf32>
      tpu.vector_store %arg12[%c0_91, %c0_92], %496 {strides = array<i32>} : memref<8x32xf32, #tpu.memory_space<vmem>>, vector<8x32xf32>,
      %c0_93 = arith.constant 0 : index
      %c0_94 = arith.constant 0 : index
      %498 = vector.load %arg3[%c0_93, %c0_94] : memref<8x32xf32, #tpu.memory_space<vmem>>, vector<8x32xf32>
      %c0_95 = arith.constant 0 : index
      %c0_96 = arith.constant 0 : index
      %499 = vector.load %arg13[%c0_95, %c0_96] : memref<8x32xf32, #tpu.memory_space<vmem>>, vector<8x32xf32>
      tpu.vector_store %arg13[%c0_95, %c0_96], %498 {strides = array<i32>} : memref<8x32xf32, #tpu.memory_space<vmem>>, vector<8x32xf32>,
      %c0_97 = arith.constant 0 : index
      %c0_98 = arith.constant 0 : index
      %500 = vector.load %arg4[%c0_97, %c0_98] : memref<8x32xf32, #tpu.memory_space<vmem>>, vector<8x32xf32>
      %c0_99 = arith.constant 0 : index
      %c0_100 = arith.constant 0 : index
      %501 = vector.load %arg14[%c0_99, %c0_100] : memref<8x32xf32, #tpu.memory_space<vmem>>, vector<8x32xf32>
      tpu.vector_store %arg14[%c0_99, %c0_100], %500 {strides = array<i32>} : memref<8x32xf32, #tpu.memory_space<vmem>>, vector<8x32xf32>,
    } else {
    }
    %c0 = arith.constant 0 : index
    %c0_1 = arith.constant 0 : index
    %3 = vector.load %arg11[%c0, %c0_1] : memref<8x32xf32, #tpu.memory_space<vmem>>, vector<8x32xf32>
    %c0_2 = arith.constant 0 : index
    %c0_3 = arith.constant 0 : index
    %4 = vector.load %arg12[%c0_2, %c0_3] : memref<8x32xf32, #tpu.memory_space<vmem>>, vector<8x32xf32>
    %c0_4 = arith.constant 0 : index
    %c0_5 = arith.constant 0 : index
    %5 = vector.load %arg13[%c0_4, %c0_5] : memref<8x32xf32, #tpu.memory_space<vmem>>, vector<8x32xf32>
    %c0_6 = arith.constant 0 : index
    %c0_7 = arith.constant 0 : index
    %6 = vector.load %arg14[%c0_6, %c0_7] : memref<8x32xf32, #tpu.memory_space<vmem>>, vector<8x32xf32>
    %c0_8 = arith.constant 0 : index
    %c0_9 = arith.constant 0 : index
    %7 = vector.load %arg2[%c0_8, %c0_9] : memref<8x1xi32, #tpu.memory_space<vmem>>, vector<8x1xi32>
    %c0_10 = arith.constant 0 : index
    %c0_11 = arith.constant 0 : index
    %8 = vector.load %arg6[%c0_10, %c0_11] : memref<32x128xbf16, #tpu.memory_space<vmem>>, vector<32x128xbf16>
    %c0_12 = arith.constant 0 : index
    %c0_13 = arith.constant 0 : index
    %9 = vector.load %arg7[%c0_12, %c0_13] : memref<32x128xbf16, #tpu.memory_space<vmem>>, vector<32x128xbf16>
    %c0_14 = arith.constant 0 : index
    %c0_15 = arith.constant 0 : index
    %10 = vector.load %arg8[%c0_14, %c0_15] : memref<32x128xbf16, #tpu.memory_space<vmem>>, vector<32x128xbf16>
    %c0_16 = arith.constant 0 : index
    %c0_17 = arith.constant 0 : index
    %11 = vector.load %arg9[%c0_16, %c0_17] : memref<1x128xf32, #tpu.memory_space<vmem>>, vector<1x128xf32>
    %12 = vector.shape_cast %11 : vector<1x128xf32> to vector<1x128xf32>
    %13 = vector.broadcast %12 : vector<1x128xf32> to vector<8x128xf32>
    %c8_i32 = arith.constant 8 : i32
    %14 = arith.muli %arg1, %c8_i32 : i32
    %c0_i32_18 = arith.constant 0 : i32
    %15 = arith.addi %14, %c0_i32_18 : i32
    %16 = vector.broadcast %15 : i32 to vector<8x1xi32>
    %17 = arith.cmpi slt, %16, %7 : vector<8x1xi32>
    %c0_19 = arith.constant 0 : index
    %c0_20 = arith.constant 0 : index
    %c0_21 = arith.constant 0 : index
    %18 = vector.load %arg5[%c0_19, %c0_20, %c0_21] : memref<8x8x128xbf16, #tpu.memory_space<vmem>>, vector<1x8x128xbf16>
    %19 = vector.shape_cast %18 : vector<1x8x128xbf16> to vector<8x128xbf16>
    %20 = arith.extf %19 : vector<8x128xbf16> to vector<8x128xf32>
    %21 = arith.truncf %3 : vector<8x32xf32> to vector<8x32xbf16>
    %cst = arith.constant dense<0.000000e+00> : vector<8x128xf32>
    %22 = tpu.matmul %21, %8, %cst {dimension_numbers = #tpu.dot_dimension_numbers<[1], [0], [0], [1], [0, 0, 1, 1], [], []>} : vector<8x32xbf16>, vector<32x128xbf16>, vector<8x128xf32> -> vector<8x128xf32>
    %23 = arith.addf %20, %22 : vector<8x128xf32>
    %24 = vector.extract_strided_slice %23 {offsets = [0, 0], sizes = [8, 96], strides = [1, 1]} : vector<8x128xf32> to vector<8x96xf32>
    %25 = arith.negf %24 : vector<8x96xf32>
    %26 = math.exp %25 : vector<8x96xf32>
    %cst_22 = arith.constant 1.000000e+00 : f32
    %27 = vector.broadcast %cst_22 : f32 to vector<8x96xf32>
    %28 = arith.addf %27, %26 : vector<8x96xf32>
    %29 = arith.divf %27, %28 : vector<8x96xf32>
    %30 = vector.extract_strided_slice %23 {offsets = [0, 96], sizes = [8, 32], strides = [1, 1]} : vector<8x128xf32> to vector<8x32xf32>
    %31 = math.tanh %30 : vector<8x32xf32>
    %32 = vector.extract_strided_slice %29 {offsets = [0, 0], sizes = [8, 32], strides = [1, 1]} : vector<8x96xf32> to vector<8x32xf32>
    %33 = vector.extract_strided_slice %29 {offsets = [0, 32], sizes = [8, 32], strides = [1, 1]} : vector<8x96xf32> to vector<8x32xf32>
    %34 = vector.extract_strided_slice %29 {offsets = [0, 64], sizes = [8, 32], strides = [1, 1]} : vector<8x96xf32> to vector<8x32xf32>
    %35 = arith.mulf %33, %4 : vector<8x32xf32>
    %36 = arith.mulf %32, %31 : vector<8x32xf32>
    %37 = arith.addf %35, %36 : vector<8x32xf32>
    %38 = math.tanh %37 : vector<8x32xf32>
    %39 = arith.mulf %34, %38 : vector<8x32xf32>
    %40 = arith.truncf %39 : vector<8x32xf32> to vector<8x32xbf16>
    %cst_23 = arith.constant dense<0.000000e+00> : vector<8x128xf32>
    %41 = tpu.matmul %40, %9, %cst_23 {dimension_numbers = #tpu.dot_dimension_numbers<[1], [0], [0], [1], [0, 0, 1, 1], [], []>} : vector<8x32xbf16>, vector<32x128xbf16>, vector<8x128xf32> -> vector<8x128xf32>
    %42 = arith.truncf %5 : vector<8x32xf32> to vector<8x32xbf16>
    %cst_24 = arith.constant dense<0.000000e+00> : vector<8x128xf32>
    %43 = tpu.matmul %42, %10, %cst_24 {dimension_numbers = #tpu.dot_dimension_numbers<[1], [0], [0], [1], [0, 0, 1, 1], [], []>} : vector<8x32xbf16>, vector<32x128xbf16>, vector<8x128xf32> -> vector<8x128xf32>
    %44 = arith.addf %41, %43 : vector<8x128xf32>
    %45 = arith.addf %44, %13 : vector<8x128xf32>
    %46 = vector.extract_strided_slice %45 {offsets = [0, 0], sizes = [8, 96], strides = [1, 1]} : vector<8x128xf32> to vector<8x96xf32>
    %47 = arith.negf %46 : vector<8x96xf32>
    %48 = math.exp %47 : vector<8x96xf32>
    %cst_25 = arith.constant 1.000000e+00 : f32
    %49 = vector.broadcast %cst_25 : f32 to vector<8x96xf32>
    %50 = arith.addf %49, %48 : vector<8x96xf32>
    %51 = arith.divf %49, %50 : vector<8x96xf32>
    %52 = vector.extract_strided_slice %45 {offsets = [0, 96], sizes = [8, 32], strides = [1, 1]} : vector<8x128xf32> to vector<8x32xf32>
    %53 = math.tanh %52 : vector<8x32xf32>
    %54 = vector.extract_strided_slice %51 {offsets = [0, 0], sizes = [8, 32], strides = [1, 1]} : vector<8x96xf32> to vector<8x32xf32>
    %55 = vector.extract_strided_slice %51 {offsets = [0, 32], sizes = [8, 32], strides = [1, 1]} : vector<8x96xf32> to vector<8x32xf32>
    %56 = vector.extract_strided_slice %51 {offsets = [0, 64], sizes = [8, 32], strides = [1, 1]} : vector<8x96xf32> to vector<8x32xf32>
    %57 = arith.mulf %55, %6 : vector<8x32xf32>
    %58 = arith.mulf %54, %53 : vector<8x32xf32>
    %59 = arith.addf %57, %58 : vector<8x32xf32>
    %60 = math.tanh %59 : vector<8x32xf32>
    %61 = arith.mulf %56, %60 : vector<8x32xf32>
    %62 = vector.shape_cast %17 : vector<8x1xi1> to vector<8x1xi1>
    %63 = vector.broadcast %62 : vector<8x1xi1> to vector<8x32xi1>
    %64 = arith.select %63, %39, %3 : vector<8x32xi1>, vector<8x32xf32>
    %65 = vector.shape_cast %17 : vector<8x1xi1> to vector<8x1xi1>
    %66 = vector.broadcast %65 : vector<8x1xi1> to vector<8x32xi1>
    %67 = arith.select %66, %37, %4 : vector<8x32xi1>, vector<8x32xf32>
    %68 = vector.shape_cast %17 : vector<8x1xi1> to vector<8x1xi1>
    %69 = vector.broadcast %68 : vector<8x1xi1> to vector<8x32xi1>
    %70 = arith.select %69, %61, %5 : vector<8x32xi1>, vector<8x32xf32>
    %71 = vector.shape_cast %17 : vector<8x1xi1> to vector<8x1xi1>
    %72 = vector.broadcast %71 : vector<8x1xi1> to vector<8x32xi1>
    %73 = arith.select %72, %59, %6 : vector<8x32xi1>, vector<8x32xf32>
    %c1_i32 = arith.constant 1 : i32
    %74 = arith.addi %14, %c1_i32 : i32
    %75 = vector.broadcast %74 : i32 to vector<8x1xi32>
    %76 = arith.cmpi slt, %75, %7 : vector<8x1xi32>
    %c1 = arith.constant 1 : index
    %c0_26 = arith.constant 0 : index
    %c0_27 = arith.constant 0 : index
    %77 = vector.load %arg5[%c1, %c0_26, %c0_27] : memref<8x8x128xbf16, #tpu.memory_space<vmem>>, vector<1x8x128xbf16>
    %78 = vector.shape_cast %77 : vector<1x8x128xbf16> to vector<8x128xbf16>
    %79 = arith.extf %78 : vector<8x128xbf16> to vector<8x128xf32>
    %80 = arith.truncf %64 : vector<8x32xf32> to vector<8x32xbf16>
    %cst_28 = arith.constant dense<0.000000e+00> : vector<8x128xf32>
    %81 = tpu.matmul %80, %8, %cst_28 {dimension_numbers = #tpu.dot_dimension_numbers<[1], [0], [0], [1], [0, 0, 1, 1], [], []>} : vector<8x32xbf16>, vector<32x128xbf16>, vector<8x128xf32> -> vector<8x128xf32>
    %82 = arith.addf %79, %81 : vector<8x128xf32>
    %83 = vector.extract_strided_slice %82 {offsets = [0, 0], sizes = [8, 96], strides = [1, 1]} : vector<8x128xf32> to vector<8x96xf32>
    %84 = arith.negf %83 : vector<8x96xf32>
    %85 = math.exp %84 : vector<8x96xf32>
    %cst_29 = arith.constant 1.000000e+00 : f32
    %86 = vector.broadcast %cst_29 : f32 to vector<8x96xf32>
    %87 = arith.addf %86, %85 : vector<8x96xf32>
    %88 = arith.divf %86, %87 : vector<8x96xf32>
    %89 = vector.extract_strided_slice %82 {offsets = [0, 96], sizes = [8, 32], strides = [1, 1]} : vector<8x128xf32> to vector<8x32xf32>
    %90 = math.tanh %89 : vector<8x32xf32>
    %91 = vector.extract_strided_slice %88 {offsets = [0, 0], sizes = [8, 32], strides = [1, 1]} : vector<8x96xf32> to vector<8x32xf32>
    %92 = vector.extract_strided_slice %88 {offsets = [0, 32], sizes = [8, 32], strides = [1, 1]} : vector<8x96xf32> to vector<8x32xf32>
    %93 = vector.extract_strided_slice %88 {offsets = [0, 64], sizes = [8, 32], strides = [1, 1]} : vector<8x96xf32> to vector<8x32xf32>
    %94 = arith.mulf %92, %67 : vector<8x32xf32>
    %95 = arith.mulf %91, %90 : vector<8x32xf32>
    %96 = arith.addf %94, %95 : vector<8x32xf32>
    %97 = math.tanh %96 : vector<8x32xf32>
    %98 = arith.mulf %93, %97 : vector<8x32xf32>
    %99 = arith.truncf %98 : vector<8x32xf32> to vector<8x32xbf16>
    %cst_30 = arith.constant dense<0.000000e+00> : vector<8x128xf32>
    %100 = tpu.matmul %99, %9, %cst_30 {dimension_numbers = #tpu.dot_dimension_numbers<[1], [0], [0], [1], [0, 0, 1, 1], [], []>} : vector<8x32xbf16>, vector<32x128xbf16>, vector<8x128xf32> -> vector<8x128xf32>
    %101 = arith.truncf %70 : vector<8x32xf32> to vector<8x32xbf16>
    %cst_31 = arith.constant dense<0.000000e+00> : vector<8x128xf32>
    %102 = tpu.matmul %101, %10, %cst_31 {dimension_numbers = #tpu.dot_dimension_numbers<[1], [0], [0], [1], [0, 0, 1, 1], [], []>} : vector<8x32xbf16>, vector<32x128xbf16>, vector<8x128xf32> -> vector<8x128xf32>
    %103 = arith.addf %100, %102 : vector<8x128xf32>
    %104 = arith.addf %103, %13 : vector<8x128xf32>
    %105 = vector.extract_strided_slice %104 {offsets = [0, 0], sizes = [8, 96], strides = [1, 1]} : vector<8x128xf32> to vector<8x96xf32>
    %106 = arith.negf %105 : vector<8x96xf32>
    %107 = math.exp %106 : vector<8x96xf32>
    %cst_32 = arith.constant 1.000000e+00 : f32
    %108 = vector.broadcast %cst_32 : f32 to vector<8x96xf32>
    %109 = arith.addf %108, %107 : vector<8x96xf32>
    %110 = arith.divf %108, %109 : vector<8x96xf32>
    %111 = vector.extract_strided_slice %104 {offsets = [0, 96], sizes = [8, 32], strides = [1, 1]} : vector<8x128xf32> to vector<8x32xf32>
    %112 = math.tanh %111 : vector<8x32xf32>
    %113 = vector.extract_strided_slice %110 {offsets = [0, 0], sizes = [8, 32], strides = [1, 1]} : vector<8x96xf32> to vector<8x32xf32>
    %114 = vector.extract_strided_slice %110 {offsets = [0, 32], sizes = [8, 32], strides = [1, 1]} : vector<8x96xf32> to vector<8x32xf32>
    %115 = vector.extract_strided_slice %110 {offsets = [0, 64], sizes = [8, 32], strides = [1, 1]} : vector<8x96xf32> to vector<8x32xf32>
    %116 = arith.mulf %114, %73 : vector<8x32xf32>
    %117 = arith.mulf %113, %112 : vector<8x32xf32>
    %118 = arith.addf %116, %117 : vector<8x32xf32>
    %119 = math.tanh %118 : vector<8x32xf32>
    %120 = arith.mulf %115, %119 : vector<8x32xf32>
    %121 = vector.shape_cast %76 : vector<8x1xi1> to vector<8x1xi1>
    %122 = vector.broadcast %121 : vector<8x1xi1> to vector<8x32xi1>
    %123 = arith.select %122, %98, %64 : vector<8x32xi1>, vector<8x32xf32>
    %124 = vector.shape_cast %76 : vector<8x1xi1> to vector<8x1xi1>
    %125 = vector.broadcast %124 : vector<8x1xi1> to vector<8x32xi1>
    %126 = arith.select %125, %96, %67 : vector<8x32xi1>, vector<8x32xf32>
    %127 = vector.shape_cast %76 : vector<8x1xi1> to vector<8x1xi1>
    %128 = vector.broadcast %127 : vector<8x1xi1> to vector<8x32xi1>
    %129 = arith.select %128, %120, %70 : vector<8x32xi1>, vector<8x32xf32>
    %130 = vector.shape_cast %76 : vector<8x1xi1> to vector<8x1xi1>
    %131 = vector.broadcast %130 : vector<8x1xi1> to vector<8x32xi1>
    %132 = arith.select %131, %118, %73 : vector<8x32xi1>, vector<8x32xf32>
    %c2_i32 = arith.constant 2 : i32
    %133 = arith.addi %14, %c2_i32 : i32
    %134 = vector.broadcast %133 : i32 to vector<8x1xi32>
    %135 = arith.cmpi slt, %134, %7 : vector<8x1xi32>
    %c2 = arith.constant 2 : index
    %c0_33 = arith.constant 0 : index
    %c0_34 = arith.constant 0 : index
    %136 = vector.load %arg5[%c2, %c0_33, %c0_34] : memref<8x8x128xbf16, #tpu.memory_space<vmem>>, vector<1x8x128xbf16>
    %137 = vector.shape_cast %136 : vector<1x8x128xbf16> to vector<8x128xbf16>
    %138 = arith.extf %137 : vector<8x128xbf16> to vector<8x128xf32>
    %139 = arith.truncf %123 : vector<8x32xf32> to vector<8x32xbf16>
    %cst_35 = arith.constant dense<0.000000e+00> : vector<8x128xf32>
    %140 = tpu.matmul %139, %8, %cst_35 {dimension_numbers = #tpu.dot_dimension_numbers<[1], [0], [0], [1], [0, 0, 1, 1], [], []>} : vector<8x32xbf16>, vector<32x128xbf16>, vector<8x128xf32> -> vector<8x128xf32>
    %141 = arith.addf %138, %140 : vector<8x128xf32>
    %142 = vector.extract_strided_slice %141 {offsets = [0, 0], sizes = [8, 96], strides = [1, 1]} : vector<8x128xf32> to vector<8x96xf32>
    %143 = arith.negf %142 : vector<8x96xf32>
    %144 = math.exp %143 : vector<8x96xf32>
    %cst_36 = arith.constant 1.000000e+00 : f32
    %145 = vector.broadcast %cst_36 : f32 to vector<8x96xf32>
    %146 = arith.addf %145, %144 : vector<8x96xf32>
    %147 = arith.divf %145, %146 : vector<8x96xf32>
    %148 = vector.extract_strided_slice %141 {offsets = [0, 96], sizes = [8, 32], strides = [1, 1]} : vector<8x128xf32> to vector<8x32xf32>
    %149 = math.tanh %148 : vector<8x32xf32>
    %150 = vector.extract_strided_slice %147 {offsets = [0, 0], sizes = [8, 32], strides = [1, 1]} : vector<8x96xf32> to vector<8x32xf32>
    %151 = vector.extract_strided_slice %147 {offsets = [0, 32], sizes = [8, 32], strides = [1, 1]} : vector<8x96xf32> to vector<8x32xf32>
    %152 = vector.extract_strided_slice %147 {offsets = [0, 64], sizes = [8, 32], strides = [1, 1]} : vector<8x96xf32> to vector<8x32xf32>
    %153 = arith.mulf %151, %126 : vector<8x32xf32>
    %154 = arith.mulf %150, %149 : vector<8x32xf32>
    %155 = arith.addf %153, %154 : vector<8x32xf32>
    %156 = math.tanh %155 : vector<8x32xf32>
    %157 = arith.mulf %152, %156 : vector<8x32xf32>
    %158 = arith.truncf %157 : vector<8x32xf32> to vector<8x32xbf16>
    %cst_37 = arith.constant dense<0.000000e+00> : vector<8x128xf32>
    %159 = tpu.matmul %158, %9, %cst_37 {dimension_numbers = #tpu.dot_dimension_numbers<[1], [0], [0], [1], [0, 0, 1, 1], [], []>} : vector<8x32xbf16>, vector<32x128xbf16>, vector<8x128xf32> -> vector<8x128xf32>
    %160 = arith.truncf %129 : vector<8x32xf32> to vector<8x32xbf16>
    %cst_38 = arith.constant dense<0.000000e+00> : vector<8x128xf32>
    %161 = tpu.matmul %160, %10, %cst_38 {dimension_numbers = #tpu.dot_dimension_numbers<[1], [0], [0], [1], [0, 0, 1, 1], [], []>} : vector<8x32xbf16>, vector<32x128xbf16>, vector<8x128xf32> -> vector<8x128xf32>
    %162 = arith.addf %159, %161 : vector<8x128xf32>
    %163 = arith.addf %162, %13 : vector<8x128xf32>
    %164 = vector.extract_strided_slice %163 {offsets = [0, 0], sizes = [8, 96], strides = [1, 1]} : vector<8x128xf32> to vector<8x96xf32>
    %165 = arith.negf %164 : vector<8x96xf32>
    %166 = math.exp %165 : vector<8x96xf32>
    %cst_39 = arith.constant 1.000000e+00 : f32
    %167 = vector.broadcast %cst_39 : f32 to vector<8x96xf32>
    %168 = arith.addf %167, %166 : vector<8x96xf32>
    %169 = arith.divf %167, %168 : vector<8x96xf32>
    %170 = vector.extract_strided_slice %163 {offsets = [0, 96], sizes = [8, 32], strides = [1, 1]} : vector<8x128xf32> to vector<8x32xf32>
    %171 = math.tanh %170 : vector<8x32xf32>
    %172 = vector.extract_strided_slice %169 {offsets = [0, 0], sizes = [8, 32], strides = [1, 1]} : vector<8x96xf32> to vector<8x32xf32>
    %173 = vector.extract_strided_slice %169 {offsets = [0, 32], sizes = [8, 32], strides = [1, 1]} : vector<8x96xf32> to vector<8x32xf32>
    %174 = vector.extract_strided_slice %169 {offsets = [0, 64], sizes = [8, 32], strides = [1, 1]} : vector<8x96xf32> to vector<8x32xf32>
    %175 = arith.mulf %173, %132 : vector<8x32xf32>
    %176 = arith.mulf %172, %171 : vector<8x32xf32>
    %177 = arith.addf %175, %176 : vector<8x32xf32>
    %178 = math.tanh %177 : vector<8x32xf32>
    %179 = arith.mulf %174, %178 : vector<8x32xf32>
    %180 = vector.shape_cast %135 : vector<8x1xi1> to vector<8x1xi1>
    %181 = vector.broadcast %180 : vector<8x1xi1> to vector<8x32xi1>
    %182 = arith.select %181, %157, %123 : vector<8x32xi1>, vector<8x32xf32>
    %183 = vector.shape_cast %135 : vector<8x1xi1> to vector<8x1xi1>
    %184 = vector.broadcast %183 : vector<8x1xi1> to vector<8x32xi1>
    %185 = arith.select %184, %155, %126 : vector<8x32xi1>, vector<8x32xf32>
    %186 = vector.shape_cast %135 : vector<8x1xi1> to vector<8x1xi1>
    %187 = vector.broadcast %186 : vector<8x1xi1> to vector<8x32xi1>
    %188 = arith.select %187, %179, %129 : vector<8x32xi1>, vector<8x32xf32>
    %189 = vector.shape_cast %135 : vector<8x1xi1> to vector<8x1xi1>
    %190 = vector.broadcast %189 : vector<8x1xi1> to vector<8x32xi1>
    %191 = arith.select %190, %177, %132 : vector<8x32xi1>, vector<8x32xf32>
    %c3_i32 = arith.constant 3 : i32
    %192 = arith.addi %14, %c3_i32 : i32
    %193 = vector.broadcast %192 : i32 to vector<8x1xi32>
    %194 = arith.cmpi slt, %193, %7 : vector<8x1xi32>
    %c3 = arith.constant 3 : index
    %c0_40 = arith.constant 0 : index
    %c0_41 = arith.constant 0 : index
    %195 = vector.load %arg5[%c3, %c0_40, %c0_41] : memref<8x8x128xbf16, #tpu.memory_space<vmem>>, vector<1x8x128xbf16>
    %196 = vector.shape_cast %195 : vector<1x8x128xbf16> to vector<8x128xbf16>
    %197 = arith.extf %196 : vector<8x128xbf16> to vector<8x128xf32>
    %198 = arith.truncf %182 : vector<8x32xf32> to vector<8x32xbf16>
    %cst_42 = arith.constant dense<0.000000e+00> : vector<8x128xf32>
    %199 = tpu.matmul %198, %8, %cst_42 {dimension_numbers = #tpu.dot_dimension_numbers<[1], [0], [0], [1], [0, 0, 1, 1], [], []>} : vector<8x32xbf16>, vector<32x128xbf16>, vector<8x128xf32> -> vector<8x128xf32>
    %200 = arith.addf %197, %199 : vector<8x128xf32>
    %201 = vector.extract_strided_slice %200 {offsets = [0, 0], sizes = [8, 96], strides = [1, 1]} : vector<8x128xf32> to vector<8x96xf32>
    %202 = arith.negf %201 : vector<8x96xf32>
    %203 = math.exp %202 : vector<8x96xf32>
    %cst_43 = arith.constant 1.000000e+00 : f32
    %204 = vector.broadcast %cst_43 : f32 to vector<8x96xf32>
    %205 = arith.addf %204, %203 : vector<8x96xf32>
    %206 = arith.divf %204, %205 : vector<8x96xf32>
    %207 = vector.extract_strided_slice %200 {offsets = [0, 96], sizes = [8, 32], strides = [1, 1]} : vector<8x128xf32> to vector<8x32xf32>
    %208 = math.tanh %207 : vector<8x32xf32>
    %209 = vector.extract_strided_slice %206 {offsets = [0, 0], sizes = [8, 32], strides = [1, 1]} : vector<8x96xf32> to vector<8x32xf32>
    %210 = vector.extract_strided_slice %206 {offsets = [0, 32], sizes = [8, 32], strides = [1, 1]} : vector<8x96xf32> to vector<8x32xf32>
    %211 = vector.extract_strided_slice %206 {offsets = [0, 64], sizes = [8, 32], strides = [1, 1]} : vector<8x96xf32> to vector<8x32xf32>
    %212 = arith.mulf %210, %185 : vector<8x32xf32>
    %213 = arith.mulf %209, %208 : vector<8x32xf32>
    %214 = arith.addf %212, %213 : vector<8x32xf32>
    %215 = math.tanh %214 : vector<8x32xf32>
    %216 = arith.mulf %211, %215 : vector<8x32xf32>
    %217 = arith.truncf %216 : vector<8x32xf32> to vector<8x32xbf16>
    %cst_44 = arith.constant dense<0.000000e+00> : vector<8x128xf32>
    %218 = tpu.matmul %217, %9, %cst_44 {dimension_numbers = #tpu.dot_dimension_numbers<[1], [0], [0], [1], [0, 0, 1, 1], [], []>} : vector<8x32xbf16>, vector<32x128xbf16>, vector<8x128xf32> -> vector<8x128xf32>
    %219 = arith.truncf %188 : vector<8x32xf32> to vector<8x32xbf16>
    %cst_45 = arith.constant dense<0.000000e+00> : vector<8x128xf32>
    %220 = tpu.matmul %219, %10, %cst_45 {dimension_numbers = #tpu.dot_dimension_numbers<[1], [0], [0], [1], [0, 0, 1, 1], [], []>} : vector<8x32xbf16>, vector<32x128xbf16>, vector<8x128xf32> -> vector<8x128xf32>
    %221 = arith.addf %218, %220 : vector<8x128xf32>
    %222 = arith.addf %221, %13 : vector<8x128xf32>
    %223 = vector.extract_strided_slice %222 {offsets = [0, 0], sizes = [8, 96], strides = [1, 1]} : vector<8x128xf32> to vector<8x96xf32>
    %224 = arith.negf %223 : vector<8x96xf32>
    %225 = math.exp %224 : vector<8x96xf32>
    %cst_46 = arith.constant 1.000000e+00 : f32
    %226 = vector.broadcast %cst_46 : f32 to vector<8x96xf32>
    %227 = arith.addf %226, %225 : vector<8x96xf32>
    %228 = arith.divf %226, %227 : vector<8x96xf32>
    %229 = vector.extract_strided_slice %222 {offsets = [0, 96], sizes = [8, 32], strides = [1, 1]} : vector<8x128xf32> to vector<8x32xf32>
    %230 = math.tanh %229 : vector<8x32xf32>
    %231 = vector.extract_strided_slice %228 {offsets = [0, 0], sizes = [8, 32], strides = [1, 1]} : vector<8x96xf32> to vector<8x32xf32>
    %232 = vector.extract_strided_slice %228 {offsets = [0, 32], sizes = [8, 32], strides = [1, 1]} : vector<8x96xf32> to vector<8x32xf32>
    %233 = vector.extract_strided_slice %228 {offsets = [0, 64], sizes = [8, 32], strides = [1, 1]} : vector<8x96xf32> to vector<8x32xf32>
    %234 = arith.mulf %232, %191 : vector<8x32xf32>
    %235 = arith.mulf %231, %230 : vector<8x32xf32>
    %236 = arith.addf %234, %235 : vector<8x32xf32>
    %237 = math.tanh %236 : vector<8x32xf32>
    %238 = arith.mulf %233, %237 : vector<8x32xf32>
    %239 = vector.shape_cast %194 : vector<8x1xi1> to vector<8x1xi1>
    %240 = vector.broadcast %239 : vector<8x1xi1> to vector<8x32xi1>
    %241 = arith.select %240, %216, %182 : vector<8x32xi1>, vector<8x32xf32>
    %242 = vector.shape_cast %194 : vector<8x1xi1> to vector<8x1xi1>
    %243 = vector.broadcast %242 : vector<8x1xi1> to vector<8x32xi1>
    %244 = arith.select %243, %214, %185 : vector<8x32xi1>, vector<8x32xf32>
    %245 = vector.shape_cast %194 : vector<8x1xi1> to vector<8x1xi1>
    %246 = vector.broadcast %245 : vector<8x1xi1> to vector<8x32xi1>
    %247 = arith.select %246, %238, %188 : vector<8x32xi1>, vector<8x32xf32>
    %248 = vector.shape_cast %194 : vector<8x1xi1> to vector<8x1xi1>
    %249 = vector.broadcast %248 : vector<8x1xi1> to vector<8x32xi1>
    %250 = arith.select %249, %236, %191 : vector<8x32xi1>, vector<8x32xf32>
    %c4_i32 = arith.constant 4 : i32
    %251 = arith.addi %14, %c4_i32 : i32
    %252 = vector.broadcast %251 : i32 to vector<8x1xi32>
    %253 = arith.cmpi slt, %252, %7 : vector<8x1xi32>
    %c4 = arith.constant 4 : index
    %c0_47 = arith.constant 0 : index
    %c0_48 = arith.constant 0 : index
    %254 = vector.load %arg5[%c4, %c0_47, %c0_48] : memref<8x8x128xbf16, #tpu.memory_space<vmem>>, vector<1x8x128xbf16>
    %255 = vector.shape_cast %254 : vector<1x8x128xbf16> to vector<8x128xbf16>
    %256 = arith.extf %255 : vector<8x128xbf16> to vector<8x128xf32>
    %257 = arith.truncf %241 : vector<8x32xf32> to vector<8x32xbf16>
    %cst_49 = arith.constant dense<0.000000e+00> : vector<8x128xf32>
    %258 = tpu.matmul %257, %8, %cst_49 {dimension_numbers = #tpu.dot_dimension_numbers<[1], [0], [0], [1], [0, 0, 1, 1], [], []>} : vector<8x32xbf16>, vector<32x128xbf16>, vector<8x128xf32> -> vector<8x128xf32>
    %259 = arith.addf %256, %258 : vector<8x128xf32>
    %260 = vector.extract_strided_slice %259 {offsets = [0, 0], sizes = [8, 96], strides = [1, 1]} : vector<8x128xf32> to vector<8x96xf32>
    %261 = arith.negf %260 : vector<8x96xf32>
    %262 = math.exp %261 : vector<8x96xf32>
    %cst_50 = arith.constant 1.000000e+00 : f32
    %263 = vector.broadcast %cst_50 : f32 to vector<8x96xf32>
    %264 = arith.addf %263, %262 : vector<8x96xf32>
    %265 = arith.divf %263, %264 : vector<8x96xf32>
    %266 = vector.extract_strided_slice %259 {offsets = [0, 96], sizes = [8, 32], strides = [1, 1]} : vector<8x128xf32> to vector<8x32xf32>
    %267 = math.tanh %266 : vector<8x32xf32>
    %268 = vector.extract_strided_slice %265 {offsets = [0, 0], sizes = [8, 32], strides = [1, 1]} : vector<8x96xf32> to vector<8x32xf32>
    %269 = vector.extract_strided_slice %265 {offsets = [0, 32], sizes = [8, 32], strides = [1, 1]} : vector<8x96xf32> to vector<8x32xf32>
    %270 = vector.extract_strided_slice %265 {offsets = [0, 64], sizes = [8, 32], strides = [1, 1]} : vector<8x96xf32> to vector<8x32xf32>
    %271 = arith.mulf %269, %244 : vector<8x32xf32>
    %272 = arith.mulf %268, %267 : vector<8x32xf32>
    %273 = arith.addf %271, %272 : vector<8x32xf32>
    %274 = math.tanh %273 : vector<8x32xf32>
    %275 = arith.mulf %270, %274 : vector<8x32xf32>
    %276 = arith.truncf %275 : vector<8x32xf32> to vector<8x32xbf16>
    %cst_51 = arith.constant dense<0.000000e+00> : vector<8x128xf32>
    %277 = tpu.matmul %276, %9, %cst_51 {dimension_numbers = #tpu.dot_dimension_numbers<[1], [0], [0], [1], [0, 0, 1, 1], [], []>} : vector<8x32xbf16>, vector<32x128xbf16>, vector<8x128xf32> -> vector<8x128xf32>
    %278 = arith.truncf %247 : vector<8x32xf32> to vector<8x32xbf16>
    %cst_52 = arith.constant dense<0.000000e+00> : vector<8x128xf32>
    %279 = tpu.matmul %278, %10, %cst_52 {dimension_numbers = #tpu.dot_dimension_numbers<[1], [0], [0], [1], [0, 0, 1, 1], [], []>} : vector<8x32xbf16>, vector<32x128xbf16>, vector<8x128xf32> -> vector<8x128xf32>
    %280 = arith.addf %277, %279 : vector<8x128xf32>
    %281 = arith.addf %280, %13 : vector<8x128xf32>
    %282 = vector.extract_strided_slice %281 {offsets = [0, 0], sizes = [8, 96], strides = [1, 1]} : vector<8x128xf32> to vector<8x96xf32>
    %283 = arith.negf %282 : vector<8x96xf32>
    %284 = math.exp %283 : vector<8x96xf32>
    %cst_53 = arith.constant 1.000000e+00 : f32
    %285 = vector.broadcast %cst_53 : f32 to vector<8x96xf32>
    %286 = arith.addf %285, %284 : vector<8x96xf32>
    %287 = arith.divf %285, %286 : vector<8x96xf32>
    %288 = vector.extract_strided_slice %281 {offsets = [0, 96], sizes = [8, 32], strides = [1, 1]} : vector<8x128xf32> to vector<8x32xf32>
    %289 = math.tanh %288 : vector<8x32xf32>
    %290 = vector.extract_strided_slice %287 {offsets = [0, 0], sizes = [8, 32], strides = [1, 1]} : vector<8x96xf32> to vector<8x32xf32>
    %291 = vector.extract_strided_slice %287 {offsets = [0, 32], sizes = [8, 32], strides = [1, 1]} : vector<8x96xf32> to vector<8x32xf32>
    %292 = vector.extract_strided_slice %287 {offsets = [0, 64], sizes = [8, 32], strides = [1, 1]} : vector<8x96xf32> to vector<8x32xf32>
    %293 = arith.mulf %291, %250 : vector<8x32xf32>
    %294 = arith.mulf %290, %289 : vector<8x32xf32>
    %295 = arith.addf %293, %294 : vector<8x32xf32>
    %296 = math.tanh %295 : vector<8x32xf32>
    %297 = arith.mulf %292, %296 : vector<8x32xf32>
    %298 = vector.shape_cast %253 : vector<8x1xi1> to vector<8x1xi1>
    %299 = vector.broadcast %298 : vector<8x1xi1> to vector<8x32xi1>
    %300 = arith.select %299, %275, %241 : vector<8x32xi1>, vector<8x32xf32>
    %301 = vector.shape_cast %253 : vector<8x1xi1> to vector<8x1xi1>
    %302 = vector.broadcast %301 : vector<8x1xi1> to vector<8x32xi1>
    %303 = arith.select %302, %273, %244 : vector<8x32xi1>, vector<8x32xf32>
    %304 = vector.shape_cast %253 : vector<8x1xi1> to vector<8x1xi1>
    %305 = vector.broadcast %304 : vector<8x1xi1> to vector<8x32xi1>
    %306 = arith.select %305, %297, %247 : vector<8x32xi1>, vector<8x32xf32>
    %307 = vector.shape_cast %253 : vector<8x1xi1> to vector<8x1xi1>
    %308 = vector.broadcast %307 : vector<8x1xi1> to vector<8x32xi1>
    %309 = arith.select %308, %295, %250 : vector<8x32xi1>, vector<8x32xf32>
    %c5_i32 = arith.constant 5 : i32
    %310 = arith.addi %14, %c5_i32 : i32
    %311 = vector.broadcast %310 : i32 to vector<8x1xi32>
    %312 = arith.cmpi slt, %311, %7 : vector<8x1xi32>
    %c5 = arith.constant 5 : index
    %c0_54 = arith.constant 0 : index
    %c0_55 = arith.constant 0 : index
    %313 = vector.load %arg5[%c5, %c0_54, %c0_55] : memref<8x8x128xbf16, #tpu.memory_space<vmem>>, vector<1x8x128xbf16>
    %314 = vector.shape_cast %313 : vector<1x8x128xbf16> to vector<8x128xbf16>
    %315 = arith.extf %314 : vector<8x128xbf16> to vector<8x128xf32>
    %316 = arith.truncf %300 : vector<8x32xf32> to vector<8x32xbf16>
    %cst_56 = arith.constant dense<0.000000e+00> : vector<8x128xf32>
    %317 = tpu.matmul %316, %8, %cst_56 {dimension_numbers = #tpu.dot_dimension_numbers<[1], [0], [0], [1], [0, 0, 1, 1], [], []>} : vector<8x32xbf16>, vector<32x128xbf16>, vector<8x128xf32> -> vector<8x128xf32>
    %318 = arith.addf %315, %317 : vector<8x128xf32>
    %319 = vector.extract_strided_slice %318 {offsets = [0, 0], sizes = [8, 96], strides = [1, 1]} : vector<8x128xf32> to vector<8x96xf32>
    %320 = arith.negf %319 : vector<8x96xf32>
    %321 = math.exp %320 : vector<8x96xf32>
    %cst_57 = arith.constant 1.000000e+00 : f32
    %322 = vector.broadcast %cst_57 : f32 to vector<8x96xf32>
    %323 = arith.addf %322, %321 : vector<8x96xf32>
    %324 = arith.divf %322, %323 : vector<8x96xf32>
    %325 = vector.extract_strided_slice %318 {offsets = [0, 96], sizes = [8, 32], strides = [1, 1]} : vector<8x128xf32> to vector<8x32xf32>
    %326 = math.tanh %325 : vector<8x32xf32>
    %327 = vector.extract_strided_slice %324 {offsets = [0, 0], sizes = [8, 32], strides = [1, 1]} : vector<8x96xf32> to vector<8x32xf32>
    %328 = vector.extract_strided_slice %324 {offsets = [0, 32], sizes = [8, 32], strides = [1, 1]} : vector<8x96xf32> to vector<8x32xf32>
    %329 = vector.extract_strided_slice %324 {offsets = [0, 64], sizes = [8, 32], strides = [1, 1]} : vector<8x96xf32> to vector<8x32xf32>
    %330 = arith.mulf %328, %303 : vector<8x32xf32>
    %331 = arith.mulf %327, %326 : vector<8x32xf32>
    %332 = arith.addf %330, %331 : vector<8x32xf32>
    %333 = math.tanh %332 : vector<8x32xf32>
    %334 = arith.mulf %329, %333 : vector<8x32xf32>
    %335 = arith.truncf %334 : vector<8x32xf32> to vector<8x32xbf16>
    %cst_58 = arith.constant dense<0.000000e+00> : vector<8x128xf32>
    %336 = tpu.matmul %335, %9, %cst_58 {dimension_numbers = #tpu.dot_dimension_numbers<[1], [0], [0], [1], [0, 0, 1, 1], [], []>} : vector<8x32xbf16>, vector<32x128xbf16>, vector<8x128xf32> -> vector<8x128xf32>
    %337 = arith.truncf %306 : vector<8x32xf32> to vector<8x32xbf16>
    %cst_59 = arith.constant dense<0.000000e+00> : vector<8x128xf32>
    %338 = tpu.matmul %337, %10, %cst_59 {dimension_numbers = #tpu.dot_dimension_numbers<[1], [0], [0], [1], [0, 0, 1, 1], [], []>} : vector<8x32xbf16>, vector<32x128xbf16>, vector<8x128xf32> -> vector<8x128xf32>
    %339 = arith.addf %336, %338 : vector<8x128xf32>
    %340 = arith.addf %339, %13 : vector<8x128xf32>
    %341 = vector.extract_strided_slice %340 {offsets = [0, 0], sizes = [8, 96], strides = [1, 1]} : vector<8x128xf32> to vector<8x96xf32>
    %342 = arith.negf %341 : vector<8x96xf32>
    %343 = math.exp %342 : vector<8x96xf32>
    %cst_60 = arith.constant 1.000000e+00 : f32
    %344 = vector.broadcast %cst_60 : f32 to vector<8x96xf32>
    %345 = arith.addf %344, %343 : vector<8x96xf32>
    %346 = arith.divf %344, %345 : vector<8x96xf32>
    %347 = vector.extract_strided_slice %340 {offsets = [0, 96], sizes = [8, 32], strides = [1, 1]} : vector<8x128xf32> to vector<8x32xf32>
    %348 = math.tanh %347 : vector<8x32xf32>
    %349 = vector.extract_strided_slice %346 {offsets = [0, 0], sizes = [8, 32], strides = [1, 1]} : vector<8x96xf32> to vector<8x32xf32>
    %350 = vector.extract_strided_slice %346 {offsets = [0, 32], sizes = [8, 32], strides = [1, 1]} : vector<8x96xf32> to vector<8x32xf32>
    %351 = vector.extract_strided_slice %346 {offsets = [0, 64], sizes = [8, 32], strides = [1, 1]} : vector<8x96xf32> to vector<8x32xf32>
    %352 = arith.mulf %350, %309 : vector<8x32xf32>
    %353 = arith.mulf %349, %348 : vector<8x32xf32>
    %354 = arith.addf %352, %353 : vector<8x32xf32>
    %355 = math.tanh %354 : vector<8x32xf32>
    %356 = arith.mulf %351, %355 : vector<8x32xf32>
    %357 = vector.shape_cast %312 : vector<8x1xi1> to vector<8x1xi1>
    %358 = vector.broadcast %357 : vector<8x1xi1> to vector<8x32xi1>
    %359 = arith.select %358, %334, %300 : vector<8x32xi1>, vector<8x32xf32>
    %360 = vector.shape_cast %312 : vector<8x1xi1> to vector<8x1xi1>
    %361 = vector.broadcast %360 : vector<8x1xi1> to vector<8x32xi1>
    %362 = arith.select %361, %332, %303 : vector<8x32xi1>, vector<8x32xf32>
    %363 = vector.shape_cast %312 : vector<8x1xi1> to vector<8x1xi1>
    %364 = vector.broadcast %363 : vector<8x1xi1> to vector<8x32xi1>
    %365 = arith.select %364, %356, %306 : vector<8x32xi1>, vector<8x32xf32>
    %366 = vector.shape_cast %312 : vector<8x1xi1> to vector<8x1xi1>
    %367 = vector.broadcast %366 : vector<8x1xi1> to vector<8x32xi1>
    %368 = arith.select %367, %354, %309 : vector<8x32xi1>, vector<8x32xf32>
    %c6_i32 = arith.constant 6 : i32
    %369 = arith.addi %14, %c6_i32 : i32
    %370 = vector.broadcast %369 : i32 to vector<8x1xi32>
    %371 = arith.cmpi slt, %370, %7 : vector<8x1xi32>
    %c6 = arith.constant 6 : index
    %c0_61 = arith.constant 0 : index
    %c0_62 = arith.constant 0 : index
    %372 = vector.load %arg5[%c6, %c0_61, %c0_62] : memref<8x8x128xbf16, #tpu.memory_space<vmem>>, vector<1x8x128xbf16>
    %373 = vector.shape_cast %372 : vector<1x8x128xbf16> to vector<8x128xbf16>
    %374 = arith.extf %373 : vector<8x128xbf16> to vector<8x128xf32>
    %375 = arith.truncf %359 : vector<8x32xf32> to vector<8x32xbf16>
    %cst_63 = arith.constant dense<0.000000e+00> : vector<8x128xf32>
    %376 = tpu.matmul %375, %8, %cst_63 {dimension_numbers = #tpu.dot_dimension_numbers<[1], [0], [0], [1], [0, 0, 1, 1], [], []>} : vector<8x32xbf16>, vector<32x128xbf16>, vector<8x128xf32> -> vector<8x128xf32>
    %377 = arith.addf %374, %376 : vector<8x128xf32>
    %378 = vector.extract_strided_slice %377 {offsets = [0, 0], sizes = [8, 96], strides = [1, 1]} : vector<8x128xf32> to vector<8x96xf32>
    %379 = arith.negf %378 : vector<8x96xf32>
    %380 = math.exp %379 : vector<8x96xf32>
    %cst_64 = arith.constant 1.000000e+00 : f32
    %381 = vector.broadcast %cst_64 : f32 to vector<8x96xf32>
    %382 = arith.addf %381, %380 : vector<8x96xf32>
    %383 = arith.divf %381, %382 : vector<8x96xf32>
    %384 = vector.extract_strided_slice %377 {offsets = [0, 96], sizes = [8, 32], strides = [1, 1]} : vector<8x128xf32> to vector<8x32xf32>
    %385 = math.tanh %384 : vector<8x32xf32>
    %386 = vector.extract_strided_slice %383 {offsets = [0, 0], sizes = [8, 32], strides = [1, 1]} : vector<8x96xf32> to vector<8x32xf32>
    %387 = vector.extract_strided_slice %383 {offsets = [0, 32], sizes = [8, 32], strides = [1, 1]} : vector<8x96xf32> to vector<8x32xf32>
    %388 = vector.extract_strided_slice %383 {offsets = [0, 64], sizes = [8, 32], strides = [1, 1]} : vector<8x96xf32> to vector<8x32xf32>
    %389 = arith.mulf %387, %362 : vector<8x32xf32>
    %390 = arith.mulf %386, %385 : vector<8x32xf32>
    %391 = arith.addf %389, %390 : vector<8x32xf32>
    %392 = math.tanh %391 : vector<8x32xf32>
    %393 = arith.mulf %388, %392 : vector<8x32xf32>
    %394 = arith.truncf %393 : vector<8x32xf32> to vector<8x32xbf16>
    %cst_65 = arith.constant dense<0.000000e+00> : vector<8x128xf32>
    %395 = tpu.matmul %394, %9, %cst_65 {dimension_numbers = #tpu.dot_dimension_numbers<[1], [0], [0], [1], [0, 0, 1, 1], [], []>} : vector<8x32xbf16>, vector<32x128xbf16>, vector<8x128xf32> -> vector<8x128xf32>
    %396 = arith.truncf %365 : vector<8x32xf32> to vector<8x32xbf16>
    %cst_66 = arith.constant dense<0.000000e+00> : vector<8x128xf32>
    %397 = tpu.matmul %396, %10, %cst_66 {dimension_numbers = #tpu.dot_dimension_numbers<[1], [0], [0], [1], [0, 0, 1, 1], [], []>} : vector<8x32xbf16>, vector<32x128xbf16>, vector<8x128xf32> -> vector<8x128xf32>
    %398 = arith.addf %395, %397 : vector<8x128xf32>
    %399 = arith.addf %398, %13 : vector<8x128xf32>
    %400 = vector.extract_strided_slice %399 {offsets = [0, 0], sizes = [8, 96], strides = [1, 1]} : vector<8x128xf32> to vector<8x96xf32>
    %401 = arith.negf %400 : vector<8x96xf32>
    %402 = math.exp %401 : vector<8x96xf32>
    %cst_67 = arith.constant 1.000000e+00 : f32
    %403 = vector.broadcast %cst_67 : f32 to vector<8x96xf32>
    %404 = arith.addf %403, %402 : vector<8x96xf32>
    %405 = arith.divf %403, %404 : vector<8x96xf32>
    %406 = vector.extract_strided_slice %399 {offsets = [0, 96], sizes = [8, 32], strides = [1, 1]} : vector<8x128xf32> to vector<8x32xf32>
    %407 = math.tanh %406 : vector<8x32xf32>
    %408 = vector.extract_strided_slice %405 {offsets = [0, 0], sizes = [8, 32], strides = [1, 1]} : vector<8x96xf32> to vector<8x32xf32>
    %409 = vector.extract_strided_slice %405 {offsets = [0, 32], sizes = [8, 32], strides = [1, 1]} : vector<8x96xf32> to vector<8x32xf32>
    %410 = vector.extract_strided_slice %405 {offsets = [0, 64], sizes = [8, 32], strides = [1, 1]} : vector<8x96xf32> to vector<8x32xf32>
    %411 = arith.mulf %409, %368 : vector<8x32xf32>
    %412 = arith.mulf %408, %407 : vector<8x32xf32>
    %413 = arith.addf %411, %412 : vector<8x32xf32>
    %414 = math.tanh %413 : vector<8x32xf32>
    %415 = arith.mulf %410, %414 : vector<8x32xf32>
    %416 = vector.shape_cast %371 : vector<8x1xi1> to vector<8x1xi1>
    %417 = vector.broadcast %416 : vector<8x1xi1> to vector<8x32xi1>
    %418 = arith.select %417, %393, %359 : vector<8x32xi1>, vector<8x32xf32>
    %419 = vector.shape_cast %371 : vector<8x1xi1> to vector<8x1xi1>
    %420 = vector.broadcast %419 : vector<8x1xi1> to vector<8x32xi1>
    %421 = arith.select %420, %391, %362 : vector<8x32xi1>, vector<8x32xf32>
    %422 = vector.shape_cast %371 : vector<8x1xi1> to vector<8x1xi1>
    %423 = vector.broadcast %422 : vector<8x1xi1> to vector<8x32xi1>
    %424 = arith.select %423, %415, %365 : vector<8x32xi1>, vector<8x32xf32>
    %425 = vector.shape_cast %371 : vector<8x1xi1> to vector<8x1xi1>
    %426 = vector.broadcast %425 : vector<8x1xi1> to vector<8x32xi1>
    %427 = arith.select %426, %413, %368 : vector<8x32xi1>, vector<8x32xf32>
    %c7_i32 = arith.constant 7 : i32
    %428 = arith.addi %14, %c7_i32 : i32
    %429 = vector.broadcast %428 : i32 to vector<8x1xi32>
    %430 = arith.cmpi slt, %429, %7 : vector<8x1xi32>
    %c7 = arith.constant 7 : index
    %c0_68 = arith.constant 0 : index
    %c0_69 = arith.constant 0 : index
    %431 = vector.load %arg5[%c7, %c0_68, %c0_69] : memref<8x8x128xbf16, #tpu.memory_space<vmem>>, vector<1x8x128xbf16>
    %432 = vector.shape_cast %431 : vector<1x8x128xbf16> to vector<8x128xbf16>
    %433 = arith.extf %432 : vector<8x128xbf16> to vector<8x128xf32>
    %434 = arith.truncf %418 : vector<8x32xf32> to vector<8x32xbf16>
    %cst_70 = arith.constant dense<0.000000e+00> : vector<8x128xf32>
    %435 = tpu.matmul %434, %8, %cst_70 {dimension_numbers = #tpu.dot_dimension_numbers<[1], [0], [0], [1], [0, 0, 1, 1], [], []>} : vector<8x32xbf16>, vector<32x128xbf16>, vector<8x128xf32> -> vector<8x128xf32>
    %436 = arith.addf %433, %435 : vector<8x128xf32>
    %437 = vector.extract_strided_slice %436 {offsets = [0, 0], sizes = [8, 96], strides = [1, 1]} : vector<8x128xf32> to vector<8x96xf32>
    %438 = arith.negf %437 : vector<8x96xf32>
    %439 = math.exp %438 : vector<8x96xf32>
    %cst_71 = arith.constant 1.000000e+00 : f32
    %440 = vector.broadcast %cst_71 : f32 to vector<8x96xf32>
    %441 = arith.addf %440, %439 : vector<8x96xf32>
    %442 = arith.divf %440, %441 : vector<8x96xf32>
    %443 = vector.extract_strided_slice %436 {offsets = [0, 96], sizes = [8, 32], strides = [1, 1]} : vector<8x128xf32> to vector<8x32xf32>
    %444 = math.tanh %443 : vector<8x32xf32>
    %445 = vector.extract_strided_slice %442 {offsets = [0, 0], sizes = [8, 32], strides = [1, 1]} : vector<8x96xf32> to vector<8x32xf32>
    %446 = vector.extract_strided_slice %442 {offsets = [0, 32], sizes = [8, 32], strides = [1, 1]} : vector<8x96xf32> to vector<8x32xf32>
    %447 = vector.extract_strided_slice %442 {offsets = [0, 64], sizes = [8, 32], strides = [1, 1]} : vector<8x96xf32> to vector<8x32xf32>
    %448 = arith.mulf %446, %421 : vector<8x32xf32>
    %449 = arith.mulf %445, %444 : vector<8x32xf32>
    %450 = arith.addf %448, %449 : vector<8x32xf32>
    %451 = math.tanh %450 : vector<8x32xf32>
    %452 = arith.mulf %447, %451 : vector<8x32xf32>
    %453 = arith.truncf %452 : vector<8x32xf32> to vector<8x32xbf16>
    %cst_72 = arith.constant dense<0.000000e+00> : vector<8x128xf32>
    %454 = tpu.matmul %453, %9, %cst_72 {dimension_numbers = #tpu.dot_dimension_numbers<[1], [0], [0], [1], [0, 0, 1, 1], [], []>} : vector<8x32xbf16>, vector<32x128xbf16>, vector<8x128xf32> -> vector<8x128xf32>
    %455 = arith.truncf %424 : vector<8x32xf32> to vector<8x32xbf16>
    %cst_73 = arith.constant dense<0.000000e+00> : vector<8x128xf32>
    %456 = tpu.matmul %455, %10, %cst_73 {dimension_numbers = #tpu.dot_dimension_numbers<[1], [0], [0], [1], [0, 0, 1, 1], [], []>} : vector<8x32xbf16>, vector<32x128xbf16>, vector<8x128xf32> -> vector<8x128xf32>
    %457 = arith.addf %454, %456 : vector<8x128xf32>
    %458 = arith.addf %457, %13 : vector<8x128xf32>
    %459 = vector.extract_strided_slice %458 {offsets = [0, 0], sizes = [8, 96], strides = [1, 1]} : vector<8x128xf32> to vector<8x96xf32>
    %460 = arith.negf %459 : vector<8x96xf32>
    %461 = math.exp %460 : vector<8x96xf32>
    %cst_74 = arith.constant 1.000000e+00 : f32
    %462 = vector.broadcast %cst_74 : f32 to vector<8x96xf32>
    %463 = arith.addf %462, %461 : vector<8x96xf32>
    %464 = arith.divf %462, %463 : vector<8x96xf32>
    %465 = vector.extract_strided_slice %458 {offsets = [0, 96], sizes = [8, 32], strides = [1, 1]} : vector<8x128xf32> to vector<8x32xf32>
    %466 = math.tanh %465 : vector<8x32xf32>
    %467 = vector.extract_strided_slice %464 {offsets = [0, 0], sizes = [8, 32], strides = [1, 1]} : vector<8x96xf32> to vector<8x32xf32>
    %468 = vector.extract_strided_slice %464 {offsets = [0, 32], sizes = [8, 32], strides = [1, 1]} : vector<8x96xf32> to vector<8x32xf32>
    %469 = vector.extract_strided_slice %464 {offsets = [0, 64], sizes = [8, 32], strides = [1, 1]} : vector<8x96xf32> to vector<8x32xf32>
    %470 = arith.mulf %468, %427 : vector<8x32xf32>
    %471 = arith.mulf %467, %466 : vector<8x32xf32>
    %472 = arith.addf %470, %471 : vector<8x32xf32>
    %473 = math.tanh %472 : vector<8x32xf32>
    %474 = arith.mulf %469, %473 : vector<8x32xf32>
    %475 = vector.shape_cast %430 : vector<8x1xi1> to vector<8x1xi1>
    %476 = vector.broadcast %475 : vector<8x1xi1> to vector<8x32xi1>
    %477 = arith.select %476, %452, %418 : vector<8x32xi1>, vector<8x32xf32>
    %478 = vector.shape_cast %430 : vector<8x1xi1> to vector<8x1xi1>
    %479 = vector.broadcast %478 : vector<8x1xi1> to vector<8x32xi1>
    %480 = arith.select %479, %450, %421 : vector<8x32xi1>, vector<8x32xf32>
    %481 = vector.shape_cast %430 : vector<8x1xi1> to vector<8x1xi1>
    %482 = vector.broadcast %481 : vector<8x1xi1> to vector<8x32xi1>
    %483 = arith.select %482, %474, %424 : vector<8x32xi1>, vector<8x32xf32>
    %484 = vector.shape_cast %430 : vector<8x1xi1> to vector<8x1xi1>
    %485 = vector.broadcast %484 : vector<8x1xi1> to vector<8x32xi1>
    %486 = arith.select %485, %472, %427 : vector<8x32xi1>, vector<8x32xf32>
    %c0_75 = arith.constant 0 : index
    %c0_76 = arith.constant 0 : index
    %487 = vector.load %arg11[%c0_75, %c0_76] : memref<8x32xf32, #tpu.memory_space<vmem>>, vector<8x32xf32>
    tpu.vector_store %arg11[%c0_75, %c0_76], %477 {strides = array<i32>} : memref<8x32xf32, #tpu.memory_space<vmem>>, vector<8x32xf32>,
    %c0_77 = arith.constant 0 : index
    %c0_78 = arith.constant 0 : index
    %488 = vector.load %arg12[%c0_77, %c0_78] : memref<8x32xf32, #tpu.memory_space<vmem>>, vector<8x32xf32>
    tpu.vector_store %arg12[%c0_77, %c0_78], %480 {strides = array<i32>} : memref<8x32xf32, #tpu.memory_space<vmem>>, vector<8x32xf32>,
    %c0_79 = arith.constant 0 : index
    %c0_80 = arith.constant 0 : index
    %489 = vector.load %arg13[%c0_79, %c0_80] : memref<8x32xf32, #tpu.memory_space<vmem>>, vector<8x32xf32>
    tpu.vector_store %arg13[%c0_79, %c0_80], %483 {strides = array<i32>} : memref<8x32xf32, #tpu.memory_space<vmem>>, vector<8x32xf32>,
    %c0_81 = arith.constant 0 : index
    %c0_82 = arith.constant 0 : index
    %490 = vector.load %arg14[%c0_81, %c0_82] : memref<8x32xf32, #tpu.memory_space<vmem>>, vector<8x32xf32>
    tpu.vector_store %arg14[%c0_81, %c0_82], %486 {strides = array<i32>} : memref<8x32xf32, #tpu.memory_space<vmem>>, vector<8x32xf32>,
    %c0_i32_83 = arith.constant 0 : i32
    %491 = arith.cmpi eq, %arg1, %c0_i32_83 : i32
    %492 = arith.extui %491 : i1 to i32
    %c0_i32_84 = arith.constant 0 : i32
    %493 = arith.cmpi ne, %492, %c0_i32_84 : i32
    scf.if %493 {
      %c0_85 = arith.constant 0 : index
      %c0_86 = arith.constant 0 : index
      %494 = vector.load %arg10[%c0_85, %c0_86] : memref<8x32xf32, #tpu.memory_space<vmem>>, vector<8x32xf32>
      tpu.vector_store %arg10[%c0_85, %c0_86], %483 {strides = array<i32>} : memref<8x32xf32, #tpu.memory_space<vmem>>, vector<8x32xf32>,
    } else {
    }
    return
  }
  func.func @transform_0(%arg0: i32, %arg1: i32) -> (i32, i32) {
    %c0_i32 = arith.constant 0 : i32
    %c0_i32_0 = arith.constant 0 : i32
    return %arg0, %c0_i32 : i32, i32
  }
  func.func @transform_1(%arg0: i32, %arg1: i32) -> (i32, i32) {
    %c0_i32 = arith.constant 0 : i32
    %c0_i32_0 = arith.constant 0 : i32
    return %arg0, %c0_i32 : i32, i32
  }
  func.func @transform_2(%arg0: i32, %arg1: i32) -> (i32, i32) {
    %c0_i32 = arith.constant 0 : i32
    %c0_i32_0 = arith.constant 0 : i32
    return %arg0, %c0_i32 : i32, i32
  }
  func.func @transform_3(%arg0: i32, %arg1: i32) -> (i32, i32, i32) {
    %c0_i32 = arith.constant 0 : i32
    %c0_i32_0 = arith.constant 0 : i32
    return %arg1, %arg0, %c0_i32 : i32, i32, i32
  }
  func.func @transform_4(%arg0: i32, %arg1: i32) -> (i32, i32) {
    %c0_i32 = arith.constant 0 : i32
    %c0_i32_0 = arith.constant 0 : i32
    %c0_i32_1 = arith.constant 0 : i32
    return %c0_i32, %c0_i32_0 : i32, i32
  }
  func.func @transform_5(%arg0: i32, %arg1: i32) -> (i32, i32) {
    %c0_i32 = arith.constant 0 : i32
    %c0_i32_0 = arith.constant 0 : i32
    %c0_i32_1 = arith.constant 0 : i32
    return %c0_i32, %c0_i32_0 : i32, i32
  }
  func.func @transform_6(%arg0: i32, %arg1: i32) -> (i32, i32) {
    %c0_i32 = arith.constant 0 : i32
    %c0_i32_0 = arith.constant 0 : i32
    %c0_i32_1 = arith.constant 0 : i32
    return %c0_i32, %c0_i32_0 : i32, i32
  }
  func.func @transform_7(%arg0: i32, %arg1: i32) -> (i32, i32) {
    %c0_i32 = arith.constant 0 : i32
    %c0_i32_0 = arith.constant 0 : i32
    %c0_i32_1 = arith.constant 0 : i32
    return %c0_i32, %c0_i32_0 : i32, i32
  }
  func.func @transform_8(%arg0: i32, %arg1: i32) -> (i32, i32) {
    %c0_i32 = arith.constant 0 : i32
    %c0_i32_0 = arith.constant 0 : i32
    return %arg0, %c0_i32 : i32, i32
  }
}

</mosaic_0001>

<bundles_post_ra>
// kernel: tpu_custom_call.1
= control target key start
LH: loop header
LB: loop body
LE: loop exit
PB: predicated region body
PF: predicated region fallthrough
CT: control target
= control target key end

     0   :  { %13 = vsyncpa [#allocation7], 0  ;;  %s3154_s0 = inlined_call_operand.vmem [shape: s32[8,1], index: 0, kind: input, shape index: {}]   ;;  %s3155_s1 = inlined_call_operand.hbm [shape: f32[8,32], index: 1, kind: input, shape index: {}]   ;;  %s3156_s2 = inlined_call_operand.hbm [shape: f32[8,32], index: 2, kind: input, shape index: {}]   ;;  %s3157_s3 = inlined_call_operand.hbm [shape: bf16[8,8,128], index: 3, kind: input, shape index: {}]   ;;  %s3158_s4 = inlined_call_operand.vmem [shape: bf16[32,128], index: 4, kind: input, shape index: {}]   ;;  %s3159_s5 = inlined_call_operand.hbm [shape: bf16[32,128], index: 5, kind: input, shape index: {}]   ;;  %s3160_s6 = inlined_call_operand.hbm [shape: bf16[32,128], index: 6, kind: input, shape index: {}]   ;;  %s3161_s7 = inlined_call_operand.vmem [shape: f32[1,128], index: 7, kind: input, shape index: {}]   ;;  %s3162_s8 = inlined_call_operand.hbm [shape: f32[8,32], index: 8, kind: output, shape index: {}]  }
   0x1   :  { %14 = vsyncpa [#allocation10], 0 }
   0x2   :  { %15 = vsyncpa [#allocation13], 0 }
   0x3   :  { %16 = vsyncpa [#allocation8], 0  ;;  %s2471_s27 = smov [#allocation9]  }
   0x4   :  { %s35_s28 = sshll.u32 %s2471_s27, 4  ;;  %s36_s28 = int_to_ptr.vmem [resolvable:$true] %s35_s28 }
   0x5   :  { %s2351_s29 = scalar_lea.vmem %s36_s28, 128  ;;  %p2356_p1 = scmp.lt.s32.totalorder %s36_s28, %s36_s28 }
   0x6   :  { %p2352_p0 = scmp.ne.s32.totalorder %s36_s28, %s2351_s29  ;;  %p2357_p2 = scmp.lt.s32.totalorder %s2351_s29, %s2351_s29 }
   0x8   :  { %p2358_p3 = por %p2357_p2, %p2356_p1 }
   0xa   :  { %p2359_p4 = pnand %p2358_p3, %p2352_p0 }
   0xc   :  { %2362 = shalt.err (!%p2359_p4)
}
   0xd   :  { %38 = dma.hbm_to_vmem [thread:$0]  %s3156_s2, 128, %s36_s28, [#allocation10]  }
   0xe   :  { %s2472_s10 = smov [#allocation12]   ;;  %s2473_s12 = smov [#allocation6]  }
   0xf   :  { %s58_s11 = sshll.u32 %s2472_s10, 4  ;;  %s25_s13 = sshll.u32 %s2473_s12, 4  ;;  %s59_s11 = int_to_ptr.vmem [resolvable:$true] %s58_s11  ;;  %s26_s13 = int_to_ptr.vmem [resolvable:$true] %s25_s13 }
  0x10   :  { %s2371_s14 = scalar_lea.vmem %s59_s11, 256  ;;  %p2376_p6 = scmp.lt.s32.totalorder %s59_s11, %s59_s11 }
  0x11   :  { %p2372_p5 = scmp.ne.s32.totalorder %s59_s11, %s2371_s14  ;;  %p2377_p7 = scmp.lt.s32.totalorder %s2371_s14, %s2371_s14 }
  0x13   :  { %p2378_p8 = por %p2377_p7, %p2376_p6 }
  0x15   :  { %p2379_p9 = pnand %p2378_p8, %p2372_p5 }
  0x17   :  { %2382 = shalt.err (!%p2379_p9)
}
  0x18   :  { %s2474_s15 = smov 64   ;;  %s2475_s16 = smov 4  }
  0x19   :  { %64 = dma.hbm_to_vmem [thread:$0]  %s3159_s5, 256, %s59_s11, [#allocation13], %s2474_s15, %s2474_s15, %s2475_s16  }
  0x1a   :  { %s2391_s2 = scalar_lea.vmem %s26_s13, 128  ;;  %p2396_p11 = scmp.lt.s32.totalorder %s26_s13, %s26_s13 }
  0x1b   :  { %p2392_p10 = scmp.ne.s32.totalorder %s26_s13, %s2391_s2  ;;  %p2397_p12 = scmp.lt.s32.totalorder %s2391_s2, %s2391_s2 }
  0x1d   :  { %p2398_p13 = por %p2397_p12, %p2396_p11 }
  0x1f   :  { %p2399_p0 = pnand %p2398_p13, %p2392_p10 }
  0x21   :  { %2402 = shalt.err (!%p2399_p0)
}
  0x22   :  { %28 = dma.hbm_to_vmem [thread:$0]  %s3155_s1, 128, %s26_s13, [#allocation7]  }
  0x23   :  { %s2476_s21 = smov [#allocation11]   ;;  %s2477_s23 = smov [#allocation14]  }
  0x24   :  { %s44_s22 = sshll.u32 %s2476_s21, 4  ;;  %s70_s24 = sshll.u32 %s2477_s23, 4  ;;  %s45_s22 = int_to_ptr.vmem [resolvable:$true] %s44_s22  ;;  %s71_s24 = int_to_ptr.vmem [resolvable:$true] %s70_s24 }
  0x25   :  { %s2411_s25 = scalar_lea.vmem %s45_s22, 512  ;;  %p2416_p2 = scmp.lt.s32.totalorder %s45_s22, %s45_s22 }
  0x26   :  { %p2412_p1 = scmp.ne.s32.totalorder %s45_s22, %s2411_s25  ;;  %p2417_p3 = scmp.lt.s32.totalorder %s2411_s25, %s2411_s25 }
  0x28   :  { %p2418_p4 = por %p2417_p3, %p2416_p2 }
  0x2a   :  { %p2419_p5 = pnand %p2418_p4, %p2412_p1 }
  0x2c   :  { %2422 = shalt.err (!%p2419_p5)
}
  0x2d   :  { %50 = dma.hbm_to_vmem [thread:$0]  %s3157_s3, 512, %s45_s22, [#allocation10], %s2474_s15, %s2474_s15, %s2475_s16  }
  0x2e   :  { %s2431_s1 = scalar_lea.vmem %s71_s24, 256  ;;  %p2436_p7 = scmp.lt.s32.totalorder %s71_s24, %s71_s24 }
  0x2f   :  { %p2432_p6 = scmp.ne.s32.totalorder %s71_s24, %s2431_s1  ;;  %p2437_p8 = scmp.lt.s32.totalorder %s2431_s1, %s2431_s1 }
  0x31   :  { %p2438_p9 = por %p2437_p8, %p2436_p7 }
  0x33   :  { %p2439_p10 = pnand %p2438_p9, %p2432_p6 }
  0x35   :  { %2442 = shalt.err (!%p2439_p10)
}
  0x36   :  { %76 = dma.hbm_to_vmem [thread:$0]  %s3160_s6, 256, %s71_s24, [#allocation13], %s2474_s15, %s2474_s15, %s2475_s16  }
  0x37   :  { %2463 = dma.done.wait [#allocation7], 128  }
  0x38   :  { %2464 = vsyncadd [#allocation7], 4294967168 }
  0x39   :  { %2465 = dma.done.wait [#allocation10], 640  }
  0x3a   :  { %2466 = vsyncadd [#allocation10], 4294966656 }
  0x3b   :  { %2467 = dma.done.wait [#allocation13], 512  }
  0x3c   :  { %2468 = vsyncadd [#allocation13], 4294966784  ;;  %v2478_v0 = vmov 0.0   ;;  %vm2479_vm0 = vmmov 0   ;;  %v2562_v1 = vld [vmem:[%s3158_s4 + $0x8] sm:$0xff]   ;;  %vm100_vm1 = vcmask 261120  }
  0x3d   :  { %1994 = vmatprep.subr.bf16.mxu0 %v2478_v0  ;;  %1998 = vmatprep.mubr.msk.bf16.mxu0 %vm2479_vm0, %v2478_v0  ;;  %v2568_v2 = vld [vmem:[%s3158_s4] sm:$0xff]   ;;  %v99_v3 = vld [vmem:[#allocation6] sm:$0xff]  ;;  %v102_v6 = vld [vmem:[#allocation9] sm:$0xff]  ;;  %v2480_v14 = vmov 0   ;;  %s2481_s9 = smov 32   ;;  %s2483_s20 = smov [#allocation15]  }
  0x3e   :  { %2002 = vmatprep.subr.bf16.mxu1 %v2478_v0  ;;  %2006 = vmatprep.mubr.msk.bf16.mxu1 %vm2479_vm0, %v2478_v0  ;;  %101 = vst.msk [vmem:[#allocation2] sm:$0xff] %vm100_vm1, %v99_v3  ;;  %105 = vst.msk [vmem:[#allocation4] sm:$0xff] %vm100_vm1, %v99_v3  ;;  %v2580_v7 = vld [vmem:[#allocation11] sm:$0xff]   ;;  %v2602_v29 = vld [vmem:[#allocation14 + $0x8] sm:$0xff]   ;;  %s1856_s21 = sshll.u32 %s2483_s20, 4  ;;  %s1857_s21 = int_to_ptr.vmem [resolvable:$true] %s1856_s21 }
  0x3f   :  { %1995 = vmatpush3.bf16.msra.mxu0 %v2562_v1  ;;  %103 = vst.msk [vmem:[#allocation3] sm:$0xff] %vm100_vm1, %v102_v6  ;;  %107 = vst.msk [vmem:[#allocation5] sm:$0xff] %vm100_vm1, %v102_v6  ;;  %v136_v8 = vunpack.c.l.bf16 %v2580_v7  ;;  %2199 = vset.pattern.permute.xlu1 %v2480_v14  ;;  %v2590_v20 = vld [vmem:[%s3154_s0] sm:$0xff]  ;;  %v2604_v30 = vld [vmem:[#allocation12 + $0x8] sm:$0xff]   ;;  %v389_v49 = vunpack.c.h.bf16 %v2580_v7  ;;  %s2443_s22 = scalar_lea.vmem %s1857_s21, 128  ;;  %p2448_p12 = scmp.lt.s32.totalorder %s1857_s21, %s1857_s21 }
  0x40   :  { %1996 = vmatprep.subr.bf16.mxu0 %v2478_v0  ;;  %2200 = vset.pattern.permute.xlu0 %v2480_v14  ;;  %vm1868_vm2 = vcmp.gt.s32.totalorder %v2590_v20, 0  ;;  %v2607_v31 = vld [vmem:[#allocation14] sm:$0xff]   ;;  %v2613_v33 = vld [vmem:[#allocation12] sm:$0xff]   ;;  %vm1880_vm4 = vcmp.gt.s32.totalorder %v2590_v20, 1  ;;  %vm1886_vm6 = vcmp.gt.s32.totalorder %v2590_v20, 2  ;;  %vm1892_vm8 = vcmp.gt.s32.totalorder %v2590_v20, 3  ;;  %p2444_p11 = scmp.ne.s32.totalorder %s1857_s21, %s2443_s22  ;;  %p2449_p13 = scmp.lt.s32.totalorder %s2443_s22, %s2443_s22 }
  0x41   :  { %v367_v24 = vsel %vm1868_vm2, 1, %v2480_v14  ;;  %2003 = vmatpush3.bf16.msra.mxu1 %v2602_v29  ;;  %v2659_v50 = vld [vmem:[%s3161_s7] ss:$0 sm:$0xff]  ;;  %vm1898_vm10 = vcmp.gt.s32.totalorder %v2590_v20, 4  ;;  %vm1904_vm12 = vcmp.gt.s32.totalorder %v2590_v20, 5 }
  0x42   :  { %2004 = vmatprep.subr.bf16.mxu1 %v2478_v0  ;;  %p2450_p0 = por %p2449_p13, %p2448_p12 }
  0x43   :  { %1997 = vmatpush3.bf16.msra.mxu0 %v2568_v2 }
  0x44   :  { %2010 = vmatprep.subr.bf16.mxu0 %v2478_v0  ;;  %p2451_p1 = pnand %p2450_p0, %p2444_p11 }
  0x45   :  { %v108_v4 = vld [vmem:[#allocation2] sm:$0xff]  ;;  %v2609_v32 = vld [vmem:[#allocation4] sm:$0xff]  ;;  %2005 = vmatpush3.bf16.msra.mxu1 %v2607_v31 }
  0x46   :  { %v137_v5 = vpack.c.bf16 %v108_v4, %v108_v4  ;;  %v109_v16 = vld [vmem:[#allocation3] sm:$0xff]  ;;  %v224_v34 = vpack.c.bf16 %v2609_v32, %v2609_v32  ;;  %2018 = vmatprep.subr.bf16.mxu1 %v2478_v0  ;;  %v111_v3 = vld [vmem:[#allocation5] sm:$0xff] }
  0x48   :  { %1999 = vmatmul.mubr.msk.bf16.vlgmr.msra.gmra.mxu0 %vm100_vm1, %v137_v5  ;;  %2007 = vmatmul.mubr.msk.bf16.vlgmr.msra.gmra.mxu1 %vm100_vm1, %v224_v34 }
  0x49   :  { %2014 = vmatprep.mubr.msk.bf16.mxu0 %vm2479_vm0, %v2478_v0  ;;  %2011 = vmatpush3.bf16.msra.mxu0 %v2604_v30 }
  0x4a   :  { %2012 = vmatprep.subr.bf16.mxu0 %v2478_v0  ;;  %2019 = vmatpush3.bf16.msra.mxu1 %v2562_v1 }
  0x4b   :  { %2022 = vmatprep.mubr.msk.bf16.mxu1 %vm2479_vm0, %v2478_v0  ;;  %2020 = vmatprep.subr.bf16.mxu1 %v2478_v0 }
  0x4d   :  { %2013 = vmatpush3.bf16.msra.mxu0 %v2613_v33 }
  0x4e   :  { %2026 = vmatprep.subr.bf16.mxu0 %v2478_v0  ;;  %2021 = vmatpush3.bf16.msra.mxu1 %v2568_v2 }
  0x4f   :  { %2034 = vmatprep.subr.bf16.mxu1 %v2478_v0 }
 0x108   :  { %v188_v9 = vpop.f32.mrf.mxu0  ;;  %v274_v43 = vpop.f32.mrf.mxu1 }
 0x109   :  { %v194_v10 = vadd.f32 %v188_v9, %v136_v8 }
 0x10a   :  { %v2000_v11 = vpop.f32.mrf.mxu0  ;;  %v2008_v44 = vpop.f32.mrf.mxu1 }
 0x10b   :  { %2207 = vtanh.f32 %v194_v10  ;;  %v1872_v17 = vmul.f32 -1.442695, %v194_v10 }
 0x10c   :  { %v191_v12 = vpop.f32.mrf.mxu0  ;;  %v277_v45 = vpop.f32.mrf.mxu1 }
 0x10d   :  { %2209 = vpow2.f32 %v1872_v17 }
 0x10e   :  { %v2001_v13 = vpop.f32.mrf.mxu0  ;;  %v2009_v46 = vpop.f32.mrf.mxu1 }
 0x118   :  { %v2208_v15 = vpop.eup %2207 }
 0x119   :  { %208 = vrot.lane.b32.xlu0 %v2208_v15, %s2481_s9 }
 0x11a   :  { %v2210_v18 = vpop.eup %2209 }
 0x11b   :  { %v198_v19 = vadd.f32 1.0, %v2210_v18 }
 0x11d   :  { %203 = vrot.lane.b32.xlu0 %v109_v16, %s2481_s9  ;;  %2211 = vrcp.f32 %v198_v19 }
 0x12a   :  { %v2212_v21 = vpop.eup %2211 }
 0x18b   :  { %v209_v22 = vpop.permute.xlu0 %208 }
 0x18c   :  { %v211_v23 = vmul.f32 %v2212_v21, %v209_v22 }
 0x18e   :  { %213 = vrot.lane.b32.xlu1 %v211_v23, %s2481_s9 }
 0x18f   :  { %v2596_v25 = vpop.permute.xlu0 %203 }
 0x190   :  { %v206_v26 = vmul.f32 %v2212_v21, %v2596_v25 }
 0x192   :  { %369 = vperm.xlu1 %2199, %v367_v24  }
 0x196   :  { %373 = vrot.lane.b32.xlu1 %v108_v4, %s2474_s15 }
 0x200   :  { %v214_v27 = vpop.permute.xlu1 %213 }
 0x201   :  { %v2599_v28 = vadd.f32 %v214_v27, %v206_v26 }
 0x203   :  { %2213 = vtanh.f32 %v2599_v28 }
 0x20d   :  { %v2630_v36 = vpop.permute.xlu1 %369 }
 0x20e   :  { %vm371_vm3 = vcmp.eq.s32.totalorder %v2630_v36, 1 }
 0x20f   :  { %v2673_v18 = vsel %vm371_vm3, %v2599_v28, %v2596_v25  ;;  %v581_v25 = vsel %vm1880_vm4, 1, %v2480_v14 }
 0x210   :  { %v2214_v35 = vpop.eup %2213 }
 0x211   :  { %219 = vrot.lane.b32.xlu0 %v2214_v35, %s2481_s9  ;;  %v374_v38 = vpop.permute.xlu1 %373 }
 0x283   :  { %v220_v37 = vpop.permute.xlu0 %219 }
 0x284   :  { %v222_v39 = vmul.f32 %v2212_v21, %v220_v37 }
 0x286   :  { %v2635_v40 = vsel %vm371_vm3, %v222_v39, %v374_v38  ;;  %v223_v41 = vpack.c.bf16 %v222_v39, %v222_v39 }
 0x287   :  { %v390_v42 = vpack.c.bf16 %v2635_v40, %v2635_v40 }
 0x288   :  { %281 = vrot.lane.b32.xlu0 %v223_v41, %s2474_s15 }
 0x289   :  { %392 = vrot.lane.b32.xlu1 %v390_v42, %s2474_s15 }
 0x2fa   :  { %v282_v47 = vpop.permute.xlu0 %281 }
 0x2fb   :  { %v393_v48 = vpop.permute.xlu1 %392  ;;  %2015 = vmatmul.mubr.msk.bf16.vlgmr.msra.gmra.mxu0 %vm100_vm1, %v282_v47 }
 0x2fc   :  { %2023 = vmatmul.mubr.msk.bf16.vlgmr.msra.gmra.mxu1 %vm100_vm1, %v393_v48  ;;  %2027 = vmatpush3.bf16.msra.mxu0 %v2602_v29 }
 0x2fd   :  { %2028 = vmatprep.subr.bf16.mxu0 %v2478_v0  ;;  %2035 = vmatpush3.bf16.msra.mxu1 %v2604_v30 }
 0x2fe   :  { %2030 = vmatprep.mubr.msk.bf16.mxu0 %vm2479_vm0, %v2478_v0  ;;  %2036 = vmatprep.subr.bf16.mxu1 %v2478_v0 }
 0x2ff   :  { %2038 = vmatprep.mubr.msk.bf16.mxu1 %vm2479_vm0, %v2478_v0 }
 0x300   :  { %2029 = vmatpush3.bf16.msra.mxu0 %v2607_v31 }
 0x301   :  { %2037 = vmatpush3.bf16.msra.mxu1 %v2613_v33  ;;  %2042 = vmatprep.subr.bf16.mxu0 %v2478_v0 }
 0x302   :  { %2050 = vmatprep.subr.bf16.mxu1 %v2478_v0 }
 0x3bb   :  { %v332_v51 = vpop.f32.mrf.mxu0 }
 0x3bc   :  { %v333_v52 = vadd.f32 %v332_v51, %v274_v43  ;;  %v431_v53 = vpop.f32.mrf.mxu1  ;;  %v2729_v51 = vld [vmem:[#allocation11 + $0x8] sm:$0xff]  }
 0x3bd   :  { %v437_v54 = vadd.f32 %v431_v53, %v389_v49  ;;  %v2016_v55 = vpop.f32.mrf.mxu0 }
 0x3be   :  { %v338_v56 = vadd.f32 %v2659_v50, %v333_v52  ;;  %v2024_v57 = vpop.f32.mrf.mxu1 }
 0x3bf   :  { %2215 = vtanh.f32 %v437_v54  ;;  %v335_v58 = vpop.f32.mrf.mxu0  ;;  %v1882_v4 = vmul.f32 -1.442695, %v437_v54  ;;  %v595_v57 = vunpack.c.l.bf16 %v2729_v51 }
 0x3c0   :  { %2217 = vtanh.f32 %v338_v56  ;;  %v434_v59 = vpop.f32.mrf.mxu1  ;;  %v1879_v5 = vmul.f32 -1.442695, %v338_v56 }
 0x3c1   :  { %v2017_v60 = vpop.f32.mrf.mxu0  ;;  %2219 = vpow2.f32 %v1882_v4 }
 0x3c2   :  { %v2025_v61 = vpop.f32.mrf.mxu1  ;;  %2221 = vpow2.f32 %v1879_v5 }
 0x3cc   :  { %v2216_v62 = vpop.eup %2215 }
 0x3cd   :  { %v2218_v63 = vpop.eup %2217  ;;  %447 = vrot.lane.b32.xlu1 %v2216_v62, %s2481_s9 }
 0x3ce   :  { %352 = vrot.lane.b32.xlu0 %v2218_v63, %s2481_s9  ;;  %v2220_v6 = vpop.eup %2219 }
 0x3cf   :  { %v2222_v7 = vpop.eup %2221  ;;  %v441_v8 = vadd.f32 1.0, %v2220_v6 }
 0x3d0   :  { %v342_v9 = vadd.f32 1.0, %v2222_v7 }
 0x3d1   :  { %2223 = vrcp.f32 %v441_v8 }
 0x3d2   :  { %347 = vrot.lane.b32.xlu0 %v111_v3, %s2481_s9  ;;  %2225 = vrcp.f32 %v342_v9 }
 0x3de   :  { %v2224_v10 = vpop.eup %2223 }
 0x3df   :  { %v2226_v12 = vpop.eup %2225  ;;  %v445_v19 = vmul.f32 %v2224_v10, %v2673_v18 }
 0x43f   :  { %v448_v11 = vpop.permute.xlu1 %447 }
 0x440   :  { %v450_v13 = vmul.f32 %v2224_v10, %v448_v11  ;;  %v353_v15 = vpop.permute.xlu0 %352 }
 0x441   :  { %v355_v16 = vmul.f32 %v2226_v12, %v353_v15 }
 0x442   :  { %452 = vrot.lane.b32.xlu0 %v450_v13, %s2481_s9 }
 0x443   :  { %357 = vrot.lane.b32.xlu1 %v355_v16, %s2481_s9 }
 0x444   :  { %v2667_v17 = vpop.permute.xlu0 %347 }
 0x445   :  { %v350_v21 = vmul.f32 %v2226_v12, %v2667_v17 }
 0x4b4   :  { %v453_v22 = vpop.permute.xlu0 %452 }
 0x4b5   :  { %v2677_v23 = vadd.f32 %v453_v22, %v445_v19  ;;  %v358_v24 = vpop.permute.xlu1 %357 }
 0x4b6   :  { %v2679_v26 = vadd.f32 %v358_v24, %v350_v21  ;;  %v787_v24 = vsel %vm1886_vm6, 1, %v2480_v14 }
 0x4b7   :  { %2227 = vtanh.f32 %v2677_v23 }
 0x4b8   :  { %2229 = vtanh.f32 %v2679_v26 }
 0x4c4   :  { %v2228_v27 = vpop.eup %2227 }
 0x4c5   :  { %v2230_v34 = vpop.eup %2229  ;;  %458 = vrot.lane.b32.xlu0 %v2228_v27, %s2481_s9  ;;  %v2743_v27 = vsel %vm371_vm3, %v2679_v26, %v2667_v17 }
 0x4c6   :  { %363 = vrot.lane.b32.xlu1 %v2230_v34, %s2481_s9 }
 0x4c9   :  { %583 = vperm.xlu0 %2200, %v581_v25  }
 0x4ca   :  { %379 = vrot.lane.b32.xlu1 %v2609_v32, %s2474_s15 }
 0x537   :  { %v459_v35 = vpop.permute.xlu0 %458 }
 0x538   :  { %v364_v28 = vpop.permute.xlu1 %363  ;;  %v461_v41 = vmul.f32 %v2224_v10, %v459_v35 }
 0x539   :  { %v366_v37 = vmul.f32 %v2226_v12, %v364_v28 }
 0x53a   :  { %v462_v43 = vpack.c.bf16 %v461_v41, %v461_v41 }
 0x53c   :  { %v380_v38 = vpop.permute.xlu1 %379 }
 0x53d   :  { %v2691_v39 = vsel %vm371_vm3, %v366_v37, %v380_v38 }
 0x53e   :  { %v463_v42 = vpack.c.bf16 %v2691_v39, %v2691_v39 }
 0x540   :  { %465 = vrot.lane.b32.xlu1 %v463_v42, %s2474_s15 }
 0x544   :  { %v2696_v44 = vpop.permute.xlu0 %583  ;;  %511 = vrot.lane.b32.xlu1 %v462_v43, %s2474_s15 }
 0x545   :  { %vm585_vm5 = vcmp.eq.s32.totalorder %v2696_v44, 1 }
 0x546   :  { %v2703_v32 = vsel %vm585_vm5, %v461_v41, %v2635_v40  ;;  %v2752_v35 = vsel %vm585_vm5, %v2677_v23, %v2673_v18 }
 0x547   :  { %v596_v45 = vpack.c.bf16 %v2703_v32, %v2703_v32 }
 0x549   :  { %598 = vrot.lane.b32.xlu0 %v596_v45, %s2474_s15 }
 0x5b2   :  { %v466_v46 = vpop.permute.xlu1 %465 }
 0x5b3   :  { %2031 = vmatmul.mubr.msk.bf16.vlgmr.msra.gmra.mxu0 %vm100_vm1, %v466_v46 }
 0x5b4   :  { %2043 = vmatpush3.bf16.msra.mxu0 %v2562_v1  ;;  %2046 = vmatprep.mubr.msk.bf16.mxu0 %vm2479_vm0, %v2478_v0 }
 0x5b5   :  { %2044 = vmatprep.subr.bf16.mxu0 %v2478_v0 }
 0x5b6   :  { %v512_v47 = vpop.permute.xlu1 %511 }
 0x5b7   :  { %2039 = vmatmul.mubr.msk.bf16.vlgmr.msra.gmra.mxu1 %vm100_vm1, %v512_v47 }
 0x5b8   :  { %2045 = vmatpush3.bf16.msra.mxu0 %v2568_v2  ;;  %2051 = vmatpush3.bf16.msra.mxu1 %v2602_v29 }
 0x5b9   :  { %2058 = vmatprep.subr.bf16.mxu0 %v2478_v0  ;;  %2052 = vmatprep.subr.bf16.mxu1 %v2478_v0 }
 0x5ba   :  { %2054 = vmatprep.mubr.msk.bf16.mxu1 %vm2479_vm0, %v2478_v0 }
 0x5bb   :  { %v599_v40 = vpop.permute.xlu0 %598 }
 0x5bc   :  { %2047 = vmatmul.mubr.msk.bf16.vlgmr.msra.gmra.mxu0 %vm100_vm1, %v599_v40  ;;  %2053 = vmatpush3.bf16.msra.mxu1 %v2607_v31 }
 0x5bd   :  { %2059 = vmatpush3.bf16.msra.mxu0 %v2604_v30  ;;  %2066 = vmatprep.subr.bf16.mxu1 %v2478_v0 }
 0x5be   :  { %2060 = vmatprep.subr.bf16.mxu0 %v2478_v0  ;;  %2062 = vmatprep.mubr.msk.bf16.mxu0 %vm2479_vm0, %v2478_v0 }
 0x5c1   :  { %2061 = vmatpush3.bf16.msra.mxu0 %v2613_v33 }
 0x5c2   :  { %2074 = vmatprep.subr.bf16.mxu0 %v2478_v0 }
 0x673   :  { %v504_v48 = vpop.f32.mrf.mxu0 }
 0x675   :  { %v2032_v49 = vpop.f32.mrf.mxu0 }
 0x677   :  { %v507_v52 = vpop.f32.mrf.mxu0  ;;  %v550_v53 = vpop.f32.mrf.mxu1 }
 0x678   :  { %v551_v54 = vadd.f32 %v550_v53, %v504_v48 }
 0x679   :  { %v2033_v55 = vpop.f32.mrf.mxu0  ;;  %v2040_v56 = vpop.f32.mrf.mxu1 }
 0x67a   :  { %v556_v58 = vadd.f32 %v2659_v50, %v551_v54 }
 0x67b   :  { %v553_v59 = vpop.f32.mrf.mxu1 }
 0x67c   :  { %2231 = vtanh.f32 %v556_v58  ;;  %v637_v60 = vpop.f32.mrf.mxu0  ;;  %v1885_v7 = vmul.f32 -1.442695, %v556_v58  ;;  %v801_v58 = vunpack.c.h.bf16 %v2729_v51 }
 0x67d   :  { %v643_v61 = vadd.f32 %v637_v60, %v595_v57  ;;  %v2041_v62 = vpop.f32.mrf.mxu1 }
 0x67e   :  { %v2048_v63 = vpop.f32.mrf.mxu0 }
 0x67f   :  { %2233 = vtanh.f32 %v643_v61  ;;  %v1888_v8 = vmul.f32 -1.442695, %v643_v61 }
 0x680   :  { %v640_v3 = vpop.f32.mrf.mxu0  ;;  %2235 = vpow2.f32 %v1885_v7 }
 0x681   :  { %2237 = vpow2.f32 %v1888_v8 }
 0x682   :  { %v2049_v4 = vpop.f32.mrf.mxu0 }
 0x689   :  { %v2232_v5 = vpop.eup %2231 }
 0x68a   :  { %566 = vrot.lane.b32.xlu1 %v2232_v5, %s2481_s9 }
 0x68c   :  { %v2234_v6 = vpop.eup %2233 }
 0x68d   :  { %653 = vrot.lane.b32.xlu0 %v2234_v6, %s2481_s9  ;;  %v2236_v9 = vpop.eup %2235 }
 0x68e   :  { %v2238_v10 = vpop.eup %2237  ;;  %v560_v11 = vadd.f32 1.0, %v2236_v9 }
 0x68f   :  { %v647_v12 = vadd.f32 1.0, %v2238_v10 }
 0x690   :  { %2239 = vrcp.f32 %v560_v11 }
 0x691   :  { %2241 = vrcp.f32 %v647_v12 }
 0x69d   :  { %v2240_v13 = vpop.eup %2239 }
 0x69e   :  { %v2242_v19 = vpop.eup %2241  ;;  %v564_v34 = vmul.f32 %v2240_v13, %v2743_v27 }
 0x69f   :  { %v651_v37 = vmul.f32 %v2242_v19, %v2752_v35 }
 0x6fc   :  { %v567_v15 = vpop.permute.xlu1 %566 }
 0x6fd   :  { %v569_v16 = vmul.f32 %v2240_v13, %v567_v15 }
 0x6ff   :  { %571 = vrot.lane.b32.xlu1 %v569_v16, %s2481_s9  ;;  %v654_v21 = vpop.permute.xlu0 %653 }
 0x700   :  { %v656_v22 = vmul.f32 %v2242_v19, %v654_v21 }
 0x702   :  { %658 = vrot.lane.b32.xlu0 %v656_v22, %s2481_s9 }
 0x706   :  { %789 = vperm.xlu0 %2200, %v787_v24  }
 0x771   :  { %v572_v25 = vpop.permute.xlu1 %571 }
 0x772   :  { %v2746_v28 = vadd.f32 %v572_v25, %v564_v34 }
 0x774   :  { %2243 = vtanh.f32 %v2746_v28  ;;  %v659_v38 = vpop.permute.xlu0 %658  ;;  %v2812_v34 = vsel %vm585_vm5, %v2746_v28, %v2743_v27  ;;  %v993_v27 = vsel %vm1892_vm8, 1, %v2480_v14 }
 0x775   :  { %v2756_v41 = vadd.f32 %v659_v38, %v651_v37 }
 0x777   :  { %2245 = vtanh.f32 %v2756_v41 }
 0x781   :  { %v2244_v36 = vpop.eup %2243  ;;  %v2761_v43 = vpop.permute.xlu0 %789 }
 0x782   :  { %577 = vrot.lane.b32.xlu1 %v2244_v36, %s2481_s9  ;;  %vm791_vm7 = vcmp.eq.s32.totalorder %v2761_v43, 1 }
 0x783   :  { %v2821_v36 = vsel %vm791_vm7, %v2756_v41, %v2752_v35 }
 0x784   :  { %v2246_v17 = vpop.eup %2245 }
 0x786   :  { %664 = vrot.lane.b32.xlu1 %v2246_v17, %s2481_s9 }
 0x7f4   :  { %v578_v26 = vpop.permute.xlu1 %577 }
 0x7f5   :  { %v580_v42 = vmul.f32 %v2240_v13, %v578_v26 }
 0x7f7   :  { %v2766_v18 = vsel %vm585_vm5, %v580_v42, %v2691_v39 }
 0x7f8   :  { %v665_v23 = vpop.permute.xlu1 %664  ;;  %v669_v45 = vpack.c.bf16 %v2766_v18, %v2766_v18 }
 0x7f9   :  { %v667_v46 = vmul.f32 %v2242_v19, %v665_v23 }
 0x7fa   :  { %671 = vrot.lane.b32.xlu0 %v669_v45, %s2474_s15 }
 0x7fb   :  { %v668_v47 = vpack.c.bf16 %v667_v46, %v667_v46  ;;  %v2775_v40 = vsel %vm791_vm7, %v667_v46, %v2703_v32 }
 0x7fc   :  { %v802_v48 = vpack.c.bf16 %v2775_v40, %v2775_v40 }
 0x7fd   :  { %717 = vrot.lane.b32.xlu1 %v668_v47, %s2474_s15 }
 0x7fe   :  { %804 = vrot.lane.b32.xlu0 %v802_v48, %s2474_s15 }
 0x86c   :  { %v672_v39 = vpop.permute.xlu0 %671 }
 0x86d   :  { %2055 = vmatmul.mubr.msk.bf16.vlgmr.msra.gmra.mxu1 %vm100_vm1, %v672_v39 }
 0x86e   :  { %2067 = vmatpush3.bf16.msra.mxu1 %v2562_v1  ;;  %2070 = vmatprep.mubr.msk.bf16.mxu1 %vm2479_vm0, %v2478_v0 }
 0x86f   :  { %v718_v49 = vpop.permute.xlu1 %717  ;;  %2068 = vmatprep.subr.bf16.mxu1 %v2478_v0 }
 0x870   :  { %2063 = vmatmul.mubr.msk.bf16.vlgmr.msra.gmra.mxu0 %vm100_vm1, %v718_v49  ;;  %v805_v32 = vpop.permute.xlu0 %804 }
 0x871   :  { %2075 = vmatpush3.bf16.msra.mxu0 %v2602_v29  ;;  %2078 = vmatprep.mubr.msk.bf16.mxu0 %vm2479_vm0, %v2478_v0 }
 0x872   :  { %2069 = vmatpush3.bf16.msra.mxu1 %v2568_v2  ;;  %2076 = vmatprep.subr.bf16.mxu0 %v2478_v0 }
 0x873   :  { %2082 = vmatprep.subr.bf16.mxu1 %v2478_v0 }
 0x875   :  { %2071 = vmatmul.mubr.msk.bf16.vlgmr.msra.gmra.mxu1 %vm100_vm1, %v805_v32  ;;  %2077 = vmatpush3.bf16.msra.mxu0 %v2607_v31 }
 0x876   :  { %2083 = vmatpush3.bf16.msra.mxu1 %v2604_v30  ;;  %2086 = vmatprep.mubr.msk.bf16.mxu1 %vm2479_vm0, %v2478_v0 }
 0x877   :  { %2084 = vmatprep.subr.bf16.mxu1 %v2478_v0  ;;  %2090 = vmatprep.subr.bf16.mxu0 %v2478_v0 }
 0x87a   :  { %2085 = vmatpush3.bf16.msra.mxu1 %v2613_v33 }
 0x87b   :  { %2098 = vmatprep.subr.bf16.mxu1 %v2478_v0 }
 0x92d   :  { %v710_v52 = vpop.f32.mrf.mxu1 }
 0x92f   :  { %v2056_v53 = vpop.f32.mrf.mxu1 }
 0x930   :  { %v756_v54 = vpop.f32.mrf.mxu0 }
 0x931   :  { %v757_v55 = vadd.f32 %v756_v54, %v710_v52  ;;  %v713_v56 = vpop.f32.mrf.mxu1 }
 0x932   :  { %v2064_v57 = vpop.f32.mrf.mxu0 }
 0x933   :  { %v762_v59 = vadd.f32 %v2659_v50, %v757_v55  ;;  %v2057_v60 = vpop.f32.mrf.mxu1 }
 0x934   :  { %v759_v61 = vpop.f32.mrf.mxu0 }
 0x935   :  { %2247 = vtanh.f32 %v762_v59  ;;  %v843_v62 = vpop.f32.mrf.mxu1  ;;  %v1891_v9 = vmul.f32 -1.442695, %v762_v59 }
 0x936   :  { %v849_v63 = vadd.f32 %v843_v62, %v801_v58  ;;  %v2065_v3 = vpop.f32.mrf.mxu0  ;;  %v2874_v62 = vld [vmem:[#allocation11 + $0x10] sm:$0xff]  }
 0x937   :  { %v2072_v4 = vpop.f32.mrf.mxu1  ;;  %v1007_v3 = vunpack.c.l.bf16 %v2874_v62 }
 0x938   :  { %2249 = vtanh.f32 %v849_v63  ;;  %v1894_v51 = vmul.f32 -1.442695, %v849_v63 }
 0x939   :  { %v846_v5 = vpop.f32.mrf.mxu1  ;;  %2251 = vpow2.f32 %v1891_v9 }
 0x93a   :  { %2253 = vpow2.f32 %v1894_v51 }
 0x93b   :  { %v2073_v6 = vpop.f32.mrf.mxu1 }
 0x942   :  { %v2248_v7 = vpop.eup %2247 }
 0x943   :  { %772 = vrot.lane.b32.xlu1 %v2248_v7, %s2481_s9 }
 0x945   :  { %v2250_v8 = vpop.eup %2249 }
 0x946   :  { %859 = vrot.lane.b32.xlu0 %v2250_v8, %s2481_s9  ;;  %v2252_v10 = vpop.eup %2251 }
 0x947   :  { %v2254_v11 = vpop.eup %2253  ;;  %v766_v12 = vadd.f32 1.0, %v2252_v10 }
 0x948   :  { %v853_v13 = vadd.f32 1.0, %v2254_v11 }
 0x949   :  { %2255 = vrcp.f32 %v766_v12 }
 0x94a   :  { %2257 = vrcp.f32 %v853_v13 }
 0x956   :  { %v2256_v15 = vpop.eup %2255 }
 0x957   :  { %v2258_v21 = vpop.eup %2257  ;;  %v770_v25 = vmul.f32 %v2256_v15, %v2812_v34 }
 0x958   :  { %v857_v17 = vmul.f32 %v2258_v21, %v2821_v36 }
 0x9b5   :  { %v773_v16 = vpop.permute.xlu1 %772 }
 0x9b6   :  { %v775_v19 = vmul.f32 %v2256_v15, %v773_v16 }
 0x9b8   :  { %v860_v22 = vpop.permute.xlu0 %859  ;;  %777 = vrot.lane.b32.xlu1 %v775_v19, %s2481_s9 }
 0x9b9   :  { %v862_v24 = vmul.f32 %v2258_v21, %v860_v22 }
 0x9bb   :  { %864 = vrot.lane.b32.xlu0 %v862_v24, %s2481_s9 }
 0xa2a   :  { %v778_v37 = vpop.permute.xlu1 %777 }
 0xa2b   :  { %v2815_v38 = vadd.f32 %v778_v37, %v770_v25 }
 0xa2d   :  { %2259 = vtanh.f32 %v2815_v38  ;;  %v865_v26 = vpop.permute.xlu0 %864 }
 0xa2e   :  { %v2825_v42 = vadd.f32 %v865_v26, %v857_v17  ;;  %v1199_v17 = vsel %vm1898_vm10, 1, %v2480_v14  ;;  %v2887_v26 = vsel %vm791_vm7, %v2815_v38, %v2812_v34 }
 0xa30   :  { %2261 = vtanh.f32 %v2825_v42 }
 0xa3a   :  { %v2260_v44 = vpop.eup %2259 }
 0xa3b   :  { %783 = vrot.lane.b32.xlu1 %v2260_v44, %s2481_s9 }
 0xa3d   :  { %v2262_v28 = vpop.eup %2261 }
 0xa3e   :  { %870 = vrot.lane.b32.xlu0 %v2262_v28, %s2481_s9 }
 0xa3f   :  { %995 = vperm.xlu1 %2199, %v993_v27  }
 0xaad   :  { %v784_v35 = vpop.permute.xlu1 %783 }
 0xaae   :  { %v786_v41 = vmul.f32 %v2256_v15, %v784_v35 }
 0xab0   :  { %v871_v23 = vpop.permute.xlu0 %870  ;;  %v2835_v45 = vsel %vm791_vm7, %v786_v41, %v2766_v18 }
 0xab1   :  { %v873_v46 = vmul.f32 %v2258_v21, %v871_v23  ;;  %v875_v47 = vpack.c.bf16 %v2835_v45, %v2835_v45 }
 0xab3   :  { %877 = vrot.lane.b32.xlu0 %v875_v47, %s2474_s15  ;;  %v874_v48 = vpack.c.bf16 %v873_v46, %v873_v46 }
 0xab5   :  { %923 = vrot.lane.b32.xlu1 %v874_v48, %s2474_s15 }
 0xaba   :  { %v2841_v39 = vpop.permute.xlu1 %995 }
 0xabb   :  { %vm997_vm9 = vcmp.eq.s32.totalorder %v2841_v39, 1  ;;  %v1405_v39 = vsel %vm1904_vm12, 1, %v2480_v14 }
 0xabc   :  { %v2847_v49 = vsel %vm997_vm9, %v873_v46, %v2775_v40  ;;  %v2897_v35 = vsel %vm997_vm9, %v2825_v42, %v2821_v36 }
 0xabd   :  { %v1008_v18 = vpack.c.bf16 %v2847_v49, %v2847_v49 }
 0xabf   :  { %1010 = vrot.lane.b32.xlu0 %v1008_v18, %s2474_s15 }
 0xb25   :  { %v878_v32 = vpop.permute.xlu0 %877 }
 0xb26   :  { %2079 = vmatmul.mubr.msk.bf16.vlgmr.msra.gmra.mxu0 %vm100_vm1, %v878_v32 }
 0xb27   :  { %v924_v52 = vpop.permute.xlu1 %923  ;;  %2091 = vmatpush3.bf16.msra.mxu0 %v2562_v1  ;;  %2094 = vmatprep.mubr.msk.bf16.mxu0 %vm2479_vm0, %v2478_v0 }
 0xb28   :  { %2087 = vmatmul.mubr.msk.bf16.vlgmr.msra.gmra.mxu1 %vm100_vm1, %v924_v52  ;;  %2092 = vmatprep.subr.bf16.mxu0 %v2478_v0 }
 0xb29   :  { %2099 = vmatpush3.bf16.msra.mxu1 %v2602_v29  ;;  %2102 = vmatprep.mubr.msk.bf16.mxu1 %vm2479_vm0, %v2478_v0 }
 0xb2a   :  { %2100 = vmatprep.subr.bf16.mxu1 %v2478_v0 }
 0xb2b   :  { %2093 = vmatpush3.bf16.msra.mxu0 %v2568_v2 }
 0xb2c   :  { %2106 = vmatprep.subr.bf16.mxu0 %v2478_v0 }
 0xb2d   :  { %2101 = vmatpush3.bf16.msra.mxu1 %v2607_v31 }
 0xb2e   :  { %2114 = vmatprep.subr.bf16.mxu1 %v2478_v0 }
 0xb31   :  { %v1011_v40 = vpop.permute.xlu0 %1010 }
 0xb32   :  { %2095 = vmatmul.mubr.msk.bf16.vlgmr.msra.gmra.mxu0 %vm100_vm1, %v1011_v40 }
 0xb33   :  { %2107 = vmatpush3.bf16.msra.mxu0 %v2604_v30  ;;  %2110 = vmatprep.mubr.msk.bf16.mxu0 %vm2479_vm0, %v2478_v0 }
 0xb34   :  { %2108 = vmatprep.subr.bf16.mxu0 %v2478_v0 }
 0xb37   :  { %2109 = vmatpush3.bf16.msra.mxu0 %v2613_v33 }
 0xb38   :  { %2122 = vmatprep.subr.bf16.mxu0 %v2478_v0 }
 0xbe6   :  { %v916_v53 = vpop.f32.mrf.mxu0 }
 0xbe8   :  { %v2080_v54 = vpop.f32.mrf.mxu0  ;;  %v962_v55 = vpop.f32.mrf.mxu1 }
 0xbe9   :  { %v963_v56 = vadd.f32 %v962_v55, %v916_v53 }
 0xbea   :  { %v919_v57 = vpop.f32.mrf.mxu0  ;;  %v2088_v58 = vpop.f32.mrf.mxu1 }
 0xbeb   :  { %v968_v59 = vadd.f32 %v2659_v50, %v963_v56  ;;  %v1213_v56 = vunpack.c.h.bf16 %v2874_v62 }
 0xbec   :  { %v2081_v60 = vpop.f32.mrf.mxu0  ;;  %v965_v61 = vpop.f32.mrf.mxu1 }
 0xbed   :  { %2263 = vtanh.f32 %v968_v59  ;;  %v1897_v10 = vmul.f32 -1.442695, %v968_v59 }
 0xbee   :  { %v2089_v63 = vpop.f32.mrf.mxu1 }
 0xbf2   :  { %v1049_v4 = vpop.f32.mrf.mxu0 }
 0xbf3   :  { %v1055_v5 = vadd.f32 %v1049_v4, %v1007_v3 }
 0xbf4   :  { %v2096_v6 = vpop.f32.mrf.mxu0 }
 0xbf5   :  { %2265 = vtanh.f32 %v1055_v5  ;;  %v1900_v11 = vmul.f32 -1.442695, %v1055_v5 }
 0xbf6   :  { %v1052_v7 = vpop.f32.mrf.mxu0  ;;  %2267 = vpow2.f32 %v1897_v10 }
 0xbf7   :  { %2269 = vpow2.f32 %v1900_v11 }
 0xbf8   :  { %v2097_v8 = vpop.f32.mrf.mxu0 }
 0xbfa   :  { %v2264_v9 = vpop.eup %2263 }
 0xbfb   :  { %978 = vrot.lane.b32.xlu1 %v2264_v9, %s2481_s9 }
 0xc02   :  { %v2266_v51 = vpop.eup %2265 }
 0xc03   :  { %1065 = vrot.lane.b32.xlu0 %v2266_v51, %s2481_s9  ;;  %v2268_v12 = vpop.eup %2267 }
 0xc04   :  { %v972_v13 = vadd.f32 1.0, %v2268_v12  ;;  %v2270_v15 = vpop.eup %2269 }
 0xc05   :  { %v1059_v16 = vadd.f32 1.0, %v2270_v15 }
 0xc06   :  { %2271 = vrcp.f32 %v972_v13 }
 0xc07   :  { %2273 = vrcp.f32 %v1059_v16 }
 0xc13   :  { %v2272_v19 = vpop.eup %2271 }
 0xc14   :  { %v2274_v24 = vpop.eup %2273  ;;  %v976_v44 = vmul.f32 %v2272_v19, %v2887_v26 }
 0xc15   :  { %v1063_v41 = vmul.f32 %v2274_v24, %v2897_v35 }
 0xc6d   :  { %v979_v21 = vpop.permute.xlu1 %978 }
 0xc6e   :  { %v981_v22 = vmul.f32 %v2272_v19, %v979_v21 }
 0xc70   :  { %983 = vrot.lane.b32.xlu1 %v981_v22, %s2481_s9 }
 0xc75   :  { %v1066_v25 = vpop.permute.xlu0 %1065 }
 0xc76   :  { %v1068_v37 = vmul.f32 %v2274_v24, %v1066_v25 }
 0xc78   :  { %1070 = vrot.lane.b32.xlu0 %v1068_v37, %s2481_s9 }
 0xc7c   :  { %1201 = vperm.xlu0 %2200, %v1199_v17  }
 0xce2   :  { %v984_v27 = vpop.permute.xlu1 %983 }
 0xce3   :  { %v2890_v28 = vadd.f32 %v984_v27, %v976_v44 }
 0xce5   :  { %2275 = vtanh.f32 %v2890_v28  ;;  %v2963_v44 = vsel %vm997_vm9, %v2890_v28, %v2887_v26 }
 0xcea   :  { %v1071_v23 = vpop.permute.xlu0 %1070 }
 0xceb   :  { %v2900_v46 = vadd.f32 %v1071_v23, %v1063_v41 }
 0xced   :  { %2277 = vtanh.f32 %v2900_v46 }
 0xcf2   :  { %v2276_v43 = vpop.eup %2275 }
 0xcf3   :  { %989 = vrot.lane.b32.xlu1 %v2276_v43, %s2481_s9 }
 0xcf7   :  { %v2913_v48 = vpop.permute.xlu0 %1201 }
 0xcf8   :  { %vm1203_vm11 = vcmp.eq.s32.totalorder %v2913_v48, 1 }
 0xcf9   :  { %v2956_v37 = vsel %vm1203_vm11, %v2900_v46, %v2897_v35 }
 0xcfa   :  { %v2278_v34 = vpop.eup %2277 }
 0xcfb   :  { %1076 = vrot.lane.b32.xlu1 %v2278_v34, %s2481_s9 }
 0xd65   :  { %v990_v38 = vpop.permute.xlu1 %989 }
 0xd66   :  { %v992_v47 = vmul.f32 %v2272_v19, %v990_v38 }
 0xd68   :  { %v2908_v36 = vsel %vm997_vm9, %v992_v47, %v2835_v45 }
 0xd69   :  { %v1081_v42 = vpack.c.bf16 %v2908_v36, %v2908_v36 }
 0xd6b   :  { %1083 = vrot.lane.b32.xlu0 %v1081_v42, %s2474_s15 }
 0xd6d   :  { %v1077_v18 = vpop.permute.xlu1 %1076 }
 0xd6e   :  { %v1079_v32 = vmul.f32 %v2274_v24, %v1077_v18 }
 0xd70   :  { %v1080_v52 = vpack.c.bf16 %v1079_v32, %v1079_v32  ;;  %v2919_v40 = vsel %vm1203_vm11, %v1079_v32, %v2847_v49 }
 0xd71   :  { %v1214_v45 = vpack.c.bf16 %v2919_v40, %v2919_v40 }
 0xd72   :  { %1129 = vrot.lane.b32.xlu1 %v1080_v52, %s2474_s15 }
 0xd73   :  { %1216 = vrot.lane.b32.xlu0 %v1214_v45, %s2474_s15 }
 0xddd   :  { %v1084_v53 = vpop.permute.xlu0 %1083 }
 0xdde   :  { %2103 = vmatmul.mubr.msk.bf16.vlgmr.msra.gmra.mxu1 %vm100_vm1, %v1084_v53 }
 0xddf   :  { %2115 = vmatpush3.bf16.msra.mxu1 %v2562_v1  ;;  %2118 = vmatprep.mubr.msk.bf16.mxu1 %vm2479_vm0, %v2478_v0 }
 0xde0   :  { %2116 = vmatprep.subr.bf16.mxu1 %v2478_v0 }
 0xde3   :  { %2117 = vmatpush3.bf16.msra.mxu1 %v2568_v2 }
 0xde4   :  { %v1130_v49 = vpop.permute.xlu1 %1129  ;;  %2130 = vmatprep.subr.bf16.mxu1 %v2478_v0 }
 0xde5   :  { %v1217_v54 = vpop.permute.xlu0 %1216  ;;  %2111 = vmatmul.mubr.msk.bf16.vlgmr.msra.gmra.mxu0 %vm100_vm1, %v1130_v49 }
 0xde6   :  { %2119 = vmatmul.mubr.msk.bf16.vlgmr.msra.gmra.mxu1 %vm100_vm1, %v1217_v54  ;;  %2123 = vmatpush3.bf16.msra.mxu0 %v2602_v29 }
 0xde7   :  { %2131 = vmatpush3.bf16.msra.mxu1 %v2604_v30  ;;  %2124 = vmatprep.subr.bf16.mxu0 %v2478_v0 }
 0xde8   :  { %2132 = vmatprep.subr.bf16.mxu1 %v2478_v0  ;;  %2134 = vmatprep.mubr.msk.bf16.mxu1 %vm2479_vm0, %v2478_v0 }
 0xde9   :  { %2126 = vmatprep.mubr.msk.bf16.mxu0 %vm2479_vm0, %v2478_v0 }
 0xdea   :  { %2125 = vmatpush3.bf16.msra.mxu0 %v2607_v31 }
 0xdeb   :  { %2133 = vmatpush3.bf16.msra.mxu1 %v2613_v33  ;;  %2138 = vmatprep.subr.bf16.mxu0 %v2478_v0 }
 0xdec   :  { %2146 = vmatprep.subr.bf16.mxu1 %v2478_v0 }
 0xe9e   :  { %v1122_v1 = vpop.f32.mrf.mxu1 }
 0xea0   :  { %v2104_v2 = vpop.f32.mrf.mxu1 }
 0xea2   :  { %v1125_v55 = vpop.f32.mrf.mxu1 }
 0xea4   :  { %v2105_v57 = vpop.f32.mrf.mxu1 }
 0xea5   :  { %v1168_v58 = vpop.f32.mrf.mxu0 }
 0xea6   :  { %v1169_v59 = vadd.f32 %v1168_v58, %v1122_v1  ;;  %v1255_v60 = vpop.f32.mrf.mxu1 }
 0xea7   :  { %v1261_v61 = vadd.f32 %v1255_v60, %v1213_v56  ;;  %v2112_v63 = vpop.f32.mrf.mxu0  ;;  %v3028_v60 = vld [vmem:[#allocation11 + $0x18] sm:$0xff]  }
 0xea8   :  { %v1174_v3 = vadd.f32 %v2659_v50, %v1169_v59  ;;  %v2120_v4 = vpop.f32.mrf.mxu1 }
 0xea9   :  { %2279 = vtanh.f32 %v1261_v61  ;;  %v1171_v5 = vpop.f32.mrf.mxu0  ;;  %v1906_v62 = vmul.f32 -1.442695, %v1261_v61  ;;  %v1419_v61 = vunpack.c.l.bf16 %v3028_v60 }
 0xeaa   :  { %2281 = vtanh.f32 %v1174_v3  ;;  %v1258_v6 = vpop.f32.mrf.mxu1  ;;  %v1903_v10 = vmul.f32 -1.442695, %v1174_v3 }
 0xeab   :  { %v2113_v7 = vpop.f32.mrf.mxu0  ;;  %2283 = vpow2.f32 %v1906_v62 }
 0xeac   :  { %v2121_v8 = vpop.f32.mrf.mxu1  ;;  %2285 = vpow2.f32 %v1903_v10 }
 0xeb6   :  { %v2280_v9 = vpop.eup %2279 }
 0xeb7   :  { %v2282_v51 = vpop.eup %2281  ;;  %1271 = vrot.lane.b32.xlu0 %v2280_v9, %s2481_s9 }
 0xeb8   :  { %1184 = vrot.lane.b32.xlu1 %v2282_v51, %s2481_s9  ;;  %v2284_v11 = vpop.eup %2283 }
 0xeb9   :  { %v2286_v12 = vpop.eup %2285  ;;  %v1265_v13 = vadd.f32 1.0, %v2284_v11 }
 0xeba   :  { %v1178_v15 = vadd.f32 1.0, %v2286_v12 }
 0xebb   :  { %2287 = vrcp.f32 %v1265_v13 }
 0xebc   :  { %2289 = vrcp.f32 %v1178_v15 }
 0xec8   :  { %v2288_v16 = vpop.eup %2287 }
 0xec9   :  { %v2290_v21 = vpop.eup %2289  ;;  %v1269_v17 = vmul.f32 %v2288_v16, %v2956_v37 }
 0xeca   :  { %v1182_v41 = vmul.f32 %v2290_v21, %v2963_v44 }
 0xf29   :  { %v1272_v19 = vpop.permute.xlu0 %1271 }
 0xf2a   :  { %v1274_v22 = vmul.f32 %v2288_v16, %v1272_v19  ;;  %v1185_v24 = vpop.permute.xlu1 %1184 }
 0xf2b   :  { %v1187_v25 = vmul.f32 %v2290_v21, %v1185_v24 }
 0xf2c   :  { %1276 = vrot.lane.b32.xlu0 %v1274_v22, %s2481_s9 }
 0xf2d   :  { %1189 = vrot.lane.b32.xlu1 %v1187_v25, %s2481_s9 }
 0xf9e   :  { %v1277_v27 = vpop.permute.xlu0 %1276 }
 0xf9f   :  { %v2966_v23 = vadd.f32 %v1277_v27, %v1269_v17  ;;  %v1190_v43 = vpop.permute.xlu1 %1189 }
 0xfa0   :  { %v2968_v34 = vadd.f32 %v1190_v43, %v1182_v41 }
 0xfa1   :  { %2291 = vtanh.f32 %v2966_v23 }
 0xfa2   :  { %2293 = vtanh.f32 %v2968_v34  ;;  %v3046_v24 = vsel %vm1203_vm11, %v2968_v34, %v2963_v44 }
 0xfae   :  { %v2292_v35 = vpop.eup %2291 }
 0xfaf   :  { %v2294_v46 = vpop.eup %2293  ;;  %1282 = vrot.lane.b32.xlu0 %v2292_v35, %s2481_s9 }
 0xfb0   :  { %1195 = vrot.lane.b32.xlu1 %v2294_v46, %s2481_s9 }
 0xfb4   :  { %1407 = vperm.xlu1 %2199, %v1405_v39  }
0x1021   :  { %v1283_v26 = vpop.permute.xlu0 %1282 }
0x1022   :  { %v1285_v28 = vmul.f32 %v2288_v16, %v1283_v26  ;;  %v1196_v38 = vpop.permute.xlu1 %1195 }
0x1023   :  { %v1198_v47 = vmul.f32 %v2290_v21, %v1196_v38  ;;  %v3037_v21 = vld [vmem:[%s3154_s0] sm:$0xff] }
0x1024   :  { %v1286_v42 = vpack.c.bf16 %v1285_v28, %v1285_v28  ;;  %vm1910_vm14 = vcmp.gt.s32.totalorder %v3037_v21, 6 }
0x1025   :  { %v2979_v18 = vsel %vm1203_vm11, %v1198_v47, %v2908_v36  ;;  %v1611_v22 = vsel %vm1910_vm14, 1, %v2480_v14 }
0x1026   :  { %1335 = vrot.lane.b32.xlu1 %v1286_v42, %s2474_s15  ;;  %v1287_v20 = vpack.c.bf16 %v2979_v18, %v2979_v18 }
0x1028   :  { %1289 = vrot.lane.b32.xlu0 %v1287_v20, %s2474_s15 }
0x102f   :  { %v2985_v32 = vpop.permute.xlu1 %1407 }
0x1030   :  { %vm1409_vm13 = vcmp.eq.s32.totalorder %v2985_v32, 1 }
0x1031   :  { %v2991_v52 = vsel %vm1409_vm13, %v1285_v28, %v2919_v40  ;;  %v3005_v40 = vld [vmem:[%s3158_s4 + $0x8] sm:$0xff]   ;;  %v3056_v41 = vsel %vm1409_vm13, %v2966_v23, %v2956_v37 }
0x1032   :  { %v1420_v36 = vpack.c.bf16 %v2991_v52, %v2991_v52 }
0x1034   :  { %1422 = vrot.lane.b32.xlu0 %v1420_v36, %s2474_s15 }
0x1098   :  { %v1336_v45 = vpop.permute.xlu1 %1335 }
0x1099   :  { %2135 = vmatmul.mubr.msk.bf16.vlgmr.msra.gmra.mxu1 %vm100_vm1, %v1336_v45  ;;  %v2338_v45 = vld [vmem:[#allocation14 + $0x8] sm:$0xff]  }
0x109a   :  { %v1290_v53 = vpop.permute.xlu0 %1289  ;;  %2147 = vmatpush3.bf16.msra.mxu1 %v2602_v29  ;;  %2150 = vmatprep.mubr.msk.bf16.mxu1 %vm2479_vm0, %v2478_v0  ;;  %v3016_v29 = vld [vmem:[%s3158_s4] sm:$0xff]  }
0x109b   :  { %2127 = vmatmul.mubr.msk.bf16.vlgmr.msra.gmra.mxu0 %vm100_vm1, %v1290_v53  ;;  %2148 = vmatprep.subr.bf16.mxu1 %v2478_v0  ;;  %v2339_v53 = vld [vmem:[#allocation12 + $0x8] sm:$0xff]  }
0x109c   :  { %2139 = vmatpush3.bf16.msra.mxu0 %v3005_v40  ;;  %2142 = vmatprep.mubr.msk.bf16.mxu0 %vm2479_vm0, %v2478_v0 }
0x109d   :  { %2140 = vmatprep.subr.bf16.mxu0 %v2478_v0 }
0x109e   :  { %2149 = vmatpush3.bf16.msra.mxu1 %v2607_v31 }
0x109f   :  { %2162 = vmatprep.subr.bf16.mxu1 %v2478_v0 }
0x10a0   :  { %2141 = vmatpush3.bf16.msra.mxu0 %v3016_v29 }
0x10a1   :  { %2154 = vmatprep.subr.bf16.mxu0 %v2478_v0 }
0x10a6   :  { %v1423_v49 = vpop.permute.xlu0 %1422 }
0x10a7   :  { %2143 = vmatmul.mubr.msk.bf16.vlgmr.msra.gmra.mxu0 %vm100_vm1, %v1423_v49 }
0x10a8   :  { %2155 = vmatpush3.bf16.msra.mxu0 %v2604_v30  ;;  %2158 = vmatprep.mubr.msk.bf16.mxu0 %vm2479_vm0, %v2478_v0 }
0x10a9   :  { %2156 = vmatprep.subr.bf16.mxu0 %v2478_v0 }
0x10ac   :  { %2157 = vmatpush3.bf16.msra.mxu0 %v2613_v33 }
0x10ad   :  { %2170 = vmatprep.subr.bf16.mxu0 %v2478_v0 }
0x1159   :  { %v1374_v31 = vpop.f32.mrf.mxu1 }
0x115b   :  { %v1328_v54 = vpop.f32.mrf.mxu0  ;;  %v2136_v1 = vpop.f32.mrf.mxu1 }
0x115c   :  { %v1375_v2 = vadd.f32 %v1374_v31, %v1328_v54 }
0x115d   :  { %v2128_v55 = vpop.f32.mrf.mxu0  ;;  %v1377_v56 = vpop.f32.mrf.mxu1 }
0x115e   :  { %v1380_v57 = vadd.f32 %v2659_v50, %v1375_v2  ;;  %v1625_v2 = vunpack.c.h.bf16 %v3028_v60 }
0x115f   :  { %v1331_v58 = vpop.f32.mrf.mxu0  ;;  %v2137_v59 = vpop.f32.mrf.mxu1 }
0x1160   :  { %2295 = vtanh.f32 %v1380_v57  ;;  %v1909_v50 = vmul.f32 -1.442695, %v1380_v57 }
0x1161   :  { %v2129_v30 = vpop.f32.mrf.mxu0 }
0x1162   :  { %v3103_v30 = vld [vmem:[%s3161_s7] ss:$0 sm:$0xff]  ;;  %s2482_s7 = smov 96  }
0x1167   :  { %v1461_v63 = vpop.f32.mrf.mxu0 }
0x1168   :  { %v1467_v33 = vadd.f32 %v1461_v63, %v1419_v61 }
0x1169   :  { %v2144_v3 = vpop.f32.mrf.mxu0 }
0x116a   :  { %2297 = vtanh.f32 %v1467_v33  ;;  %v1912_v8 = vmul.f32 -1.442695, %v1467_v33 }
0x116b   :  { %v1464_v4 = vpop.f32.mrf.mxu0  ;;  %2299 = vpow2.f32 %v1909_v50 }
0x116c   :  { %2301 = vpow2.f32 %v1912_v8 }
0x116d   :  { %v2296_v5 = vpop.eup %2295  ;;  %v2145_v6 = vpop.f32.mrf.mxu0 }
0x116e   :  { %1390 = vrot.lane.b32.xlu1 %v2296_v5, %s2481_s9 }
0x1177   :  { %v2298_v7 = vpop.eup %2297 }
0x1178   :  { %1477 = vrot.lane.b32.xlu0 %v2298_v7, %s2481_s9  ;;  %v2300_v9 = vpop.eup %2299 }
0x1179   :  { %v1384_v51 = vadd.f32 1.0, %v2300_v9  ;;  %v2302_v62 = vpop.eup %2301 }
0x117a   :  { %v1471_v10 = vadd.f32 1.0, %v2302_v62 }
0x117b   :  { %2303 = vrcp.f32 %v1384_v51 }
0x117c   :  { %2305 = vrcp.f32 %v1471_v10 }
0x1188   :  { %v2304_v11 = vpop.eup %2303 }
0x1189   :  { %v2306_v15 = vpop.eup %2305  ;;  %v1388_v25 = vmul.f32 %v2304_v11, %v3046_v24 }
0x118a   :  { %v1475_v43 = vmul.f32 %v2306_v15, %v3056_v41 }
0x11e0   :  { %v1391_v12 = vpop.permute.xlu1 %1390 }
0x11e1   :  { %v1393_v13 = vmul.f32 %v2304_v11, %v1391_v12 }
0x11e3   :  { %1395 = vrot.lane.b32.xlu1 %v1393_v13, %s2481_s9 }
0x11ea   :  { %v1478_v16 = vpop.permute.xlu0 %1477 }
0x11eb   :  { %v1480_v19 = vmul.f32 %v2306_v15, %v1478_v16 }
0x11ed   :  { %1482 = vrot.lane.b32.xlu0 %v1480_v19, %s2481_s9 }
0x11f1   :  { %1613 = vperm.xlu0 %2200, %v1611_v22  }
0x1255   :  { %v1396_v17 = vpop.permute.xlu1 %1395 }
0x1256   :  { %v3049_v27 = vadd.f32 %v1396_v17, %v1388_v25 }
0x1258   :  { %2307 = vtanh.f32 %v3049_v27  ;;  %v1413_v22 = vsel %vm1409_vm13, %v3049_v27, %v3046_v24 }
0x125f   :  { %v1483_v35 = vpop.permute.xlu0 %1482 }
0x1260   :  { %v3059_v46 = vadd.f32 %v1483_v35, %v1475_v43 }
0x1262   :  { %2309 = vtanh.f32 %v3059_v46 }
0x1265   :  { %v2308_v48 = vpop.eup %2307 }
0x1266   :  { %1401 = vrot.lane.b32.xlu1 %v2308_v48, %s2481_s9 }
0x126c   :  { %v3072_v26 = vpop.permute.xlu0 %1613 }
0x126d   :  { %vm1615_vm15 = vcmp.eq.s32.totalorder %v3072_v26, 1 }
0x126e   :  { %v3114_v16 = vsel %vm1615_vm15, %v3059_v46, %v3056_v41 }
0x126f   :  { %v2310_v44 = vpop.eup %2309 }
0x1270   :  { %1488 = vrot.lane.b32.xlu1 %v2310_v44, %s2481_s9 }
0x12d8   :  { %v1402_v34 = vpop.permute.xlu1 %1401 }
0x12d9   :  { %v1404_v39 = vmul.f32 %v2304_v11, %v1402_v34 }
0x12db   :  { %v3067_v37 = vsel %vm1409_vm13, %v1404_v39, %v2979_v18 }
0x12dc   :  { %v1493_v23 = vpack.c.bf16 %v3067_v37, %v3067_v37 }
0x12de   :  { %1495 = vrot.lane.b32.xlu0 %v1493_v23, %s2474_s15 }
0x12e2   :  { %v1489_v28 = vpop.permute.xlu1 %1488 }
0x12e3   :  { %v1491_v38 = vmul.f32 %v2306_v15, %v1489_v28 }
0x12e5   :  { %v1492_v47 = vpack.c.bf16 %v1491_v38, %v1491_v38  ;;  %v3078_v42 = vsel %vm1615_vm15, %v1491_v38, %v2991_v52 }
0x12e6   :  { %v1626_v18 = vpack.c.bf16 %v3078_v42, %v3078_v42 }
0x12e7   :  { %1541 = vrot.lane.b32.xlu1 %v1492_v47, %s2474_s15 }
0x12e8   :  { %1628 = vrot.lane.b32.xlu0 %v1626_v18, %s2474_s15 }
0x1350   :  { %v1496_v20 = vpop.permute.xlu0 %1495 }
0x1351   :  { %2151 = vmatmul.mubr.msk.bf16.vlgmr.msra.gmra.mxu1 %vm100_vm1, %v1496_v20 }
0x1352   :  { %2163 = vmatpush3.bf16.msra.mxu1 %v3005_v40  ;;  %2166 = vmatprep.mubr.msk.bf16.mxu1 %vm2479_vm0, %v2478_v0  ;;  %v2340_v40 = vld [vmem:[#allocation14] sm:$0xff]  }
0x1353   :  { %2164 = vmatprep.subr.bf16.mxu1 %v2478_v0 }
0x1356   :  { %2165 = vmatpush3.bf16.msra.mxu1 %v3016_v29  ;;  %v2341_v29 = vld [vmem:[#allocation12] sm:$0xff]  }
0x1357   :  { %2178 = vmatprep.subr.bf16.mxu1 %v2478_v0 }
0x1359   :  { %v1542_v52 = vpop.permute.xlu1 %1541 }
0x135a   :  { %v1629_v36 = vpop.permute.xlu0 %1628  ;;  %2159 = vmatmul.mubr.msk.bf16.vlgmr.msra.gmra.mxu0 %vm100_vm1, %v1542_v52 }
0x135b   :  { %2167 = vmatmul.mubr.msk.bf16.vlgmr.msra.gmra.mxu1 %vm100_vm1, %v1629_v36  ;;  %2171 = vmatpush3.bf16.msra.mxu0 %v2338_v45 }
0x135c   :  { %2179 = vmatpush3.bf16.msra.mxu1 %v2339_v53  ;;  %2172 = vmatprep.subr.bf16.mxu0 %v2478_v0 }
0x135d   :  { %2180 = vmatprep.subr.bf16.mxu1 %v2478_v0  ;;  %2182 = vmatprep.mubr.msk.bf16.mxu1 %vm2479_vm0, %v2478_v0 }
0x135e   :  { %2174 = vmatprep.mubr.msk.bf16.mxu0 %vm2479_vm0, %v2478_v0  ;;  %vm1916_vm0 = vcmp.gt.s32.totalorder %v3037_v21, 7 }
0x135f   :  { %2173 = vmatpush3.bf16.msra.mxu0 %v2340_v40 }
0x1360   :  { %2181 = vmatpush3.bf16.msra.mxu1 %v2341_v29 }
0x1411   :  { %v1534_v49 = vpop.f32.mrf.mxu1 }
0x1413   :  { %v2152_v31 = vpop.f32.mrf.mxu1 }
0x1414   :  { %v1817_v31 = vsel %vm1916_vm0, 1, %v2480_v14 }
0x1415   :  { %v1537_v54 = vpop.f32.mrf.mxu1 }
0x1417   :  { %v2153_v1 = vpop.f32.mrf.mxu1 }
0x141a   :  { %v1580_v55 = vpop.f32.mrf.mxu0 }
0x141b   :  { %v1581_v56 = vadd.f32 %v1580_v55, %v1534_v49  ;;  %v1667_v57 = vpop.f32.mrf.mxu1 }
0x141c   :  { %v1673_v58 = vadd.f32 %v1667_v57, %v1625_v2  ;;  %v2160_v59 = vpop.f32.mrf.mxu0 }
0x141d   :  { %v1586_v0 = vadd.f32 %v3103_v30, %v1581_v56  ;;  %v2168_v61 = vpop.f32.mrf.mxu1 }
0x141e   :  { %2311 = vtanh.f32 %v1673_v58  ;;  %v1583_v63 = vpop.f32.mrf.mxu0  ;;  %v1918_v6 = vmul.f32 -1.442695, %v1673_v58 }
0x141f   :  { %2313 = vtanh.f32 %v1586_v0  ;;  %v1670_v33 = vpop.f32.mrf.mxu1  ;;  %v1915_v7 = vmul.f32 -1.442695, %v1586_v0 }
0x1420   :  { %v2161_v3 = vpop.f32.mrf.mxu0  ;;  %2315 = vpow2.f32 %v1918_v6 }
0x1421   :  { %v2169_v4 = vpop.f32.mrf.mxu1  ;;  %2317 = vpow2.f32 %v1915_v7 }
0x142b   :  { %v2312_v60 = vpop.eup %2311 }
0x142c   :  { %v2314_v5 = vpop.eup %2313  ;;  %1683 = vrot.lane.b32.xlu0 %v2312_v60, %s2481_s9 }
0x142d   :  { %1596 = vrot.lane.b32.xlu1 %v2314_v5, %s2481_s9  ;;  %v2316_v50 = vpop.eup %2315 }
0x142e   :  { %v2318_v8 = vpop.eup %2317  ;;  %v1677_v9 = vadd.f32 1.0, %v2316_v50 }
0x142f   :  { %v1590_v51 = vadd.f32 1.0, %v2318_v8 }
0x1430   :  { %2319 = vrcp.f32 %v1677_v9 }
0x1431   :  { %2321 = vrcp.f32 %v1590_v51 }
0x143d   :  { %v2320_v62 = vpop.eup %2319 }
0x143e   :  { %v2322_v11 = vpop.eup %2321  ;;  %v1681_v19 = vmul.f32 %v2320_v62, %v3114_v16 }
0x143f   :  { %v1594_v17 = vmul.f32 %v2322_v11, %v1413_v22 }
0x149e   :  { %v1684_v10 = vpop.permute.xlu0 %1683 }
0x149f   :  { %v1686_v12 = vmul.f32 %v2320_v62, %v1684_v10  ;;  %v1597_v13 = vpop.permute.xlu1 %1596 }
0x14a0   :  { %v1599_v15 = vmul.f32 %v2322_v11, %v1597_v13 }
0x14a1   :  { %1688 = vrot.lane.b32.xlu0 %v1686_v12, %s2481_s9 }
0x14a2   :  { %1601 = vrot.lane.b32.xlu1 %v1599_v15, %s2481_s9 }
0x1513   :  { %v1689_v25 = vpop.permute.xlu0 %1688 }
0x1514   :  { %v3121_v43 = vadd.f32 %v1689_v25, %v1681_v19  ;;  %v1602_v35 = vpop.permute.xlu1 %1601 }
0x1515   :  { %v1604_v48 = vadd.f32 %v1602_v35, %v1594_v17 }
0x1516   :  { %2323 = vtanh.f32 %v3121_v43 }
0x1517   :  { %2325 = vtanh.f32 %v1604_v48  ;;  %v1619_v58 = vsel %vm1615_vm15, %v1604_v48, %v1413_v22 }
0x1523   :  { %v2324_v44 = vpop.eup %2323 }
0x1524   :  { %v2326_v34 = vpop.eup %2325  ;;  %1694 = vrot.lane.b32.xlu0 %v2324_v44, %s2481_s9 }
0x1525   :  { %1607 = vrot.lane.b32.xlu1 %v2326_v34, %s2481_s9 }
0x1596   :  { %v1695_v41 = vpop.permute.xlu0 %1694 }
0x1597   :  { %v1697_v46 = vmul.f32 %v2320_v62, %v1695_v41  ;;  %v1608_v39 = vpop.permute.xlu1 %1607 }
0x1598   :  { %v1610_v32 = vmul.f32 %v2322_v11, %v1608_v39 }
0x1599   :  { %v1698_v24 = vpack.c.bf16 %v1697_v46, %v1697_v46 }
0x159a   :  { %v1618_v27 = vsel %vm1615_vm15, %v1610_v32, %v3067_v37 }
0x159b   :  { %1747 = vrot.lane.b32.xlu0 %v1698_v24, %s2474_s15  ;;  %v1699_v23 = vpack.c.bf16 %v1618_v27, %v1618_v27 }
0x159d   :  { %1701 = vrot.lane.b32.xlu1 %v1699_v23, %s2474_s15 }
0x160d   :  { %v1748_v28 = vpop.permute.xlu0 %1747 }
0x160e   :  { %2183 = vmatmul.mubr.msk.bf16.vlgmr.msra.gmra.mxu1 %vm100_vm1, %v1748_v28 }
0x160f   :  { %v1702_v38 = vpop.permute.xlu1 %1701 }
0x1610   :  { %2175 = vmatmul.mubr.msk.bf16.vlgmr.msra.gmra.mxu0 %vm100_vm1, %v1702_v38 }
0x16ce   :  { %v1786_v47 = vpop.f32.mrf.mxu1 }
0x16d0   :  { %v1740_v18 = vpop.f32.mrf.mxu0  ;;  %v2184_v20 = vpop.f32.mrf.mxu1 }
0x16d1   :  { %v1787_v52 = vadd.f32 %v1786_v47, %v1740_v18 }
0x16d2   :  { %v2176_v36 = vpop.f32.mrf.mxu0  ;;  %v1789_v45 = vpop.f32.mrf.mxu1 }
0x16d3   :  { %v1792_v53 = vadd.f32 %v3103_v30, %v1787_v52 }
0x16d4   :  { %v1743_v37 = vpop.f32.mrf.mxu0  ;;  %v2185_v40 = vpop.f32.mrf.mxu1 }
0x16d5   :  { %2327 = vtanh.f32 %v1792_v53  ;;  %v1921_v54 = vmul.f32 -1.442695, %v1792_v53 }
0x16d6   :  { %v2177_v29 = vpop.f32.mrf.mxu0 }
0x16d7   :  { %2329 = vpow2.f32 %v1921_v54 }
0x16e2   :  { %v2328_v49 = vpop.eup %2327 }
0x16e3   :  { %1802 = vrot.lane.b32.xlu1 %v2328_v49, %s2481_s9 }
0x16e4   :  { %v2330_v1 = vpop.eup %2329 }
0x16e5   :  { %v1796_v2 = vadd.f32 1.0, %v2330_v1 }
0x16e7   :  { %1819 = vperm.xlu1 %2199, %v1817_v31   ;;  %2331 = vrcp.f32 %v1796_v2 }
0x16f4   :  { %v2332_v55 = vpop.eup %2331 }
0x16f5   :  { %v1800_v21 = vmul.f32 %v2332_v55, %v1619_v58 }
0x1755   :  { %v1803_v56 = vpop.permute.xlu1 %1802 }
0x1756   :  { %v1805_v57 = vmul.f32 %v2332_v55, %v1803_v56 }
0x1758   :  { %1807 = vrot.lane.b32.xlu0 %v1805_v57, %s2481_s9 }
0x1762   :  { %v1820_v0 = vpop.permute.xlu1 %1819 }
0x1763   :  { %vm1821_vm2 = vcmp.eq.s32.totalorder %v1820_v0, 1 }
0x1764   :  { %v1822_v61 = vsel %vm1821_vm2, %v1697_v46, %v3078_v42  ;;  %v1823_v60 = vsel %vm1821_vm2, %v3121_v43, %v3114_v16 }
0x17ca   :  { %v1808_v59 = vpop.permute.xlu0 %1807 }
0x17cb   :  { %v1810_v30 = vadd.f32 %v1808_v59, %v1800_v21 }
0x17cd   :  { %2333 = vtanh.f32 %v1810_v30  ;;  %v1825_v63 = vsel %vm1821_vm2, %v1810_v30, %v1619_v58 }
0x17da   :  { %v2334_v14 = vpop.eup %2333 }
0x17db   :  { %1813 = vrot.lane.b32.xlu0 %v2334_v14, %s2481_s9 }
0x17df   :  { %1827 = vrot.lane.b32.xlu0 %v1822_v61, %s2474_s15 }
0x17e3   :  { %1842 = vrot.lane.b32.xlu0 %v1825_v63, %s2482_s7 }
0x184d   :  { %v1814_v33 = vpop.permute.xlu0 %1813 }
0x184e   :  { %v1816_v3 = vmul.f32 %v2332_v55, %v1814_v33 }
0x1850   :  { %v1824_v26 = vsel %vm1821_vm2, %v1816_v3, %v1618_v27 }
0x1851   :  { %1837 = vrot.lane.b32.xlu1 %v1824_v26, %s2474_s15  ;;  %v1828_v4 = vpop.permute.xlu0 %1827 }
0x1852   :  { %1830 = vst.msk [vmem:[#allocation2] sm:$0xff] %vm100_vm1, %v1828_v4 }
0x1855   :  { %1832 = vrot.lane.b32.xlu1 %v1823_v60, %s2482_s7  ;;  %v1843_v5 = vpop.permute.xlu0 %1842 }
0x1856   :  { %1845 = vst.msk [vmem:[#allocation5] sm:$0xff] %vm100_vm1, %v1843_v5 }
0x18c3   :  { %v1838_v42 = vpop.permute.xlu1 %1837 }
0x18c4   :  { %1840 = vst.msk [vmem:[#allocation4] sm:$0xff] %vm100_vm1, %v1838_v42  ;;  %1849 = vst.msk [vmem:[#allocation15] sm:$0xff] %vm100_vm1, %v1838_v42 }
0x18c5   :  { %2454 = shalt.err (!%p2451_p1)
}
0x18c6   :  { %1859 = dma.vmem_to_hbm [thread:$0]  %s1857_s21, 128, %s3162_s8, [#allocation8]  }
0x18c7   :  { %v1833_v6 = vpop.permute.xlu1 %1832 }
0x18c8   :  { %1835 = vst.msk [vmem:[#allocation3] sm:$0xff] %vm100_vm1, %v1833_v6 }
0x18c9   :  { %2469 = dma.done.wait [#allocation8], 128  }
0x18ca   :  { %2470 = vsyncadd [#allocation8], 4294967168 }
0x18cb   :  { %1863 = vsyncpa [#allocation7], 1 }
0x18cc   :  { %1864 = vsyncpa [#allocation10], 1 }
0x18cd   :  { %1865 = vsyncpa [#allocation13], 1 }
0x18ce   :  { %1866 = vsyncpa [#allocation8], 1 }

</bundles_post_ra>
